<compile_context>
chip_gen: v7x
topology: tpu7x:2x2x1
jax: 0.10.0
libtpu: 0.0.40
codegen_flags: <defaults>
</compile_context>

<pallas_src>
import functools

import jax
import jax.numpy as jnp
from jax.experimental import pallas as pl
from jax.experimental.pallas import tpu as pltpu

# ----------------------------- configuration --------------------------------
IMG = 32          # spatial size (real model: 512)
CH = 6            # spectral bands (HLS: 6)
PATCH = 8         # patch size (real model: 16)
EMBED = 128       # embedding dim (real model: 768/1024)
HEADS = 4
HEAD_DIM = EMBED // HEADS
DEPTH = 2         # encoder depth (real model: 12/24)
MLP_DIM = 4 * EMBED
NUM_CLASSES = 4
GRID = IMG // PATCH
NPATCH = GRID * GRID
PATCH_DIM = CH * PATCH * PATCH
HEAD_OUT = NUM_CLASSES * PATCH * PATCH
LN_EPS = 1e-6


# ------------------------------ kernel helpers --------------------------------
def _layernorm(x, gamma, beta):
    """LayerNorm with single-pass statistics: var = E[x^2] - E[x]^2."""
    mu = jnp.mean(x, axis=-1, keepdims=True)
    ms = jnp.mean(x * x, axis=-1, keepdims=True)
    var = ms - mu * mu
    return (x - mu) * jax.lax.rsqrt(var + LN_EPS) * gamma + beta


# ------------------------------ Pallas kernel --------------------------------
def _fused_kernel(patches_ref, wpe_ref, extras_ref,
                  ln1g_ref, ln1b_ref, wqkv_ref, bqkv_ref, wo_ref, bo_ref,
                  ln2g_ref, ln2b_ref, w1_ref, b1_ref, w2_ref, b2_ref,
                  normg_ref, normb_ref, whead_hbm, bhead_ref,
                  o_ref, res_ref, whead_buf, head_sem, *, heads, head_dim):
    """One grid step == one encoder layer; residual stream lives in res_ref."""
    layer = pl.program_id(0)
    n_layers = pl.num_programs(0)
    embed = heads * head_dim

    # ---- layer 0: start head-weight DMA (overlaps entire encoder) + embed ---
    @pl.when(layer == 0)
    def _():
        pltpu.make_async_copy(whead_hbm, whead_buf, head_sem.at[0]).start()
        emb = jnp.dot(patches_ref[...], wpe_ref[...],
                      preferred_element_type=jnp.float32)
        res_ref[...] = emb + extras_ref[...]

    x = res_ref[...]                                        # (N, E) f32

    # ---- LayerNorm 1 (f32 stats, single pass) ----
    xn = _layernorm(x, ln1g_ref[...], ln1b_ref[...]).astype(jnp.bfloat16)

    # ---- flat QKV: one dense MXU matmul, lane-dense (N, 3E) output ----
    # sm_scale already folded into the q columns + q bias at prep time.
    qkv = jnp.dot(xn, wqkv_ref[...],
                  preferred_element_type=jnp.float32) + bqkv_ref[...]

    # ---- per-head scores / softmax / PV (memory bounded to (N,N) per head) --
    ctx_parts = []
    for h in range(heads):
        lo = h * head_dim
        q_h = qkv[:, lo:lo + head_dim].astype(jnp.bfloat16)
        k_h = qkv[:, embed + lo:embed + lo + head_dim].astype(jnp.bfloat16)
        v_h = qkv[:, 2 * embed + lo:2 * embed + lo + head_dim].astype(jnp.bfloat16)
        s = jnp.dot(q_h, k_h.T, preferred_element_type=jnp.float32)   # (N, N)
        s = s - jnp.max(s, axis=-1, keepdims=True)
        p = jnp.exp(s)
        p = p * pl.reciprocal(jnp.sum(p, axis=-1, keepdims=True), approx=True)
        ctx_parts.append(jnp.dot(p.astype(jnp.bfloat16), v_h,
                                 preferred_element_type=jnp.float32))
    # concat heads along lanes -> (N, E); single flat output projection
    ctx = jnp.concatenate(ctx_parts, axis=-1).astype(jnp.bfloat16)
    x = x + jnp.dot(ctx, wo_ref[...],
                    preferred_element_type=jnp.float32) + bo_ref[...]

    # ---- LayerNorm 2 + MLP ----
    xn2 = _layernorm(x, ln2g_ref[...], ln2b_ref[...]).astype(jnp.bfloat16)
    h1 = jnp.dot(xn2, w1_ref[...],
                 preferred_element_type=jnp.float32) + b1_ref[...]
    h1 = jax.nn.gelu(h1, approximate=True)
    x = x + jnp.dot(h1.astype(jnp.bfloat16), w2_ref[...],
                    preferred_element_type=jnp.float32) + b2_ref[...]

    res_ref[...] = x

    # ---- last layer: final encoder LN + segmentation head ----
    @pl.when(layer == n_layers - 1)
    def _():
        pltpu.make_async_copy(whead_hbm, whead_buf, head_sem.at[0]).wait()
        y = _layernorm(x, normg_ref[...], normb_ref[...]).astype(jnp.bfloat16)
        o_ref[...] = jnp.dot(y, whead_buf[...],
                             preferred_element_type=jnp.float32) + bhead_ref[...]


def encoder_forward(patches, extras, prep):
    """Patch-embed + DEPTH encoder layers + final LN + seg head, one pallas_call."""

    def full(shape):
        nd = len(shape)
        return pl.BlockSpec(shape, lambda l, _nd=nd: (0,) * _nd)

    def per_layer(shape_tail):
        nd = len(shape_tail)
        return pl.BlockSpec((None,) + tuple(shape_tail),
                            lambda l, _nd=nd: (l,) + (0,) * _nd)

    in_specs = [
        full((NPATCH, PATCH_DIM)),                  # patches (const)
        full((PATCH_DIM, EMBED)),                   # w_patch (const)
        full((NPATCH, EMBED)),                      # extras  (const)
        per_layer((1, EMBED)),                      # ln1_g
        per_layer((1, EMBED)),                      # ln1_b
        per_layer((EMBED, 3 * EMBED)),              # w_qkv (flat, q scaled)
        per_layer((1, 3 * EMBED)),                  # b_qkv
        per_layer((EMBED, EMBED)),                  # w_o   (flat)
        per_layer((1, EMBED)),                      # b_o
        per_layer((1, EMBED)),                      # ln2_g
        per_layer((1, EMBED)),                      # ln2_b
        per_layer((EMBED, MLP_DIM)),                # w_mlp1
        per_layer((1, MLP_DIM)),                    # b_mlp1
        per_layer((MLP_DIM, EMBED)),                # w_mlp2
        per_layer((1, EMBED)),                      # b_mlp2
        full((1, EMBED)),                           # norm_g (final LN, const)
        full((1, EMBED)),                           # norm_b (const)
        pl.BlockSpec(memory_space=pl.ANY),          # w_head (manual DMA)
        full((1, HEAD_OUT)),                        # b_head (const)
    ]

    args = (patches, prep["w_patch"], extras,
            prep["ln1_g"], prep["ln1_b"], prep["w_qkv"], prep["b_qkv"],
            prep["w_o"], prep["b_o"], prep["ln2_g"], prep["ln2_b"],
            prep["w_mlp1"], prep["b_mlp1"], prep["w_mlp2"], prep["b_mlp2"],
            prep["norm_g"], prep["norm_b"], prep["w_head"], prep["b_head"])

    # --- VMEM budget (double-buffered blocks + residents + scratch) ----------
    def nbytes(a):
        return int(a.size) * jnp.dtype(a.dtype).itemsize

    const_args = (patches, prep["w_patch"], extras, prep["norm_g"],
                  prep["norm_b"], prep["b_head"])
    layer_args = (prep["ln1_g"], prep["ln1_b"], prep["w_qkv"], prep["b_qkv"],
                  prep["w_o"], prep["b_o"], prep["ln2_g"], prep["ln2_b"],
                  prep["w_mlp1"], prep["b_mlp1"], prep["w_mlp2"], prep["b_mlp2"])
    per_layer_bytes = sum(nbytes(a) for a in layer_args) // DEPTH
    const_bytes = sum(nbytes(a) for a in const_args)
    out_bytes = NPATCH * HEAD_OUT * 4
    scratch_bytes = NPATCH * EMBED * 4 + EMBED * HEAD_OUT * 2
    working_set = (2 * per_layer_bytes + 2 * const_bytes + 2 * out_bytes
                   + scratch_bytes)
    vmem_limit = int(min(100 * 2**20, max(32 * 2**20, 2 * working_set)))

    # --- advisory cost estimate ----------------------------------------------
    flops = (2 * NPATCH * PATCH_DIM * EMBED
             + DEPTH * (2 * NPATCH * EMBED * 3 * EMBED     # qkv
                        + 4 * NPATCH * NPATCH * EMBED      # scores + pv
                        + 2 * NPATCH * EMBED * EMBED       # out proj
                        + 4 * NPATCH * EMBED * MLP_DIM)    # mlp
             + 2 * NPATCH * EMBED * HEAD_OUT)
    transcendentals = DEPTH * (HEADS * NPATCH * NPATCH + NPATCH * MLP_DIM)
    bytes_accessed = sum(nbytes(a) for a in args) + out_bytes

    kern = functools.partial(_fused_kernel, heads=HEADS, head_dim=HEAD_DIM)
    return pl.pallas_call(
        kern,
        grid=(DEPTH,),
        in_specs=in_specs,
        out_specs=full((NPATCH, HEAD_OUT)),
        out_shape=jax.ShapeDtypeStruct((NPATCH, HEAD_OUT), jnp.float32),
        scratch_shapes=[pltpu.VMEM((NPATCH, EMBED), jnp.float32),       # residual
                        pltpu.VMEM((EMBED, HEAD_OUT), jnp.bfloat16),    # head w
                        pltpu.SemaphoreType.DMA((1,))],
        compiler_params=pltpu.CompilerParams(
            dimension_semantics=("arbitrary",),
            vmem_limit_bytes=vmem_limit),
        cost_estimate=pl.CostEstimate(flops=flops,
                                      transcendentals=transcendentals,
                                      bytes_accessed=bytes_accessed),
    )(*args)


# ------------------------------ glue / wrapper --------------------------------
def _patchify(img_chw):
    # (C, H, W) -> (num_patches, C*P*P) flattened in (C, Ph, Pw) order,
    # matching Conv2d(kernel=stride=PATCH) weight flattening.
    c, h, w = img_chw.shape
    x = img_chw.reshape(c, GRID, PATCH, GRID, PATCH)
    x = jnp.transpose(x, (1, 3, 0, 2, 4))                 # (gh, gw, C, P, P)
    return x.reshape(NPATCH, PATCH_DIM)


def prithvi_forward(pixel_values, location_coords, prep):
    """Mirrors PrithviGeoSpatialMAE.forward(): returns model_output.output."""
    # _parse_and_validate_multimodal_data: unbind leading batch dim, take [0].
    pixel_values = pixel_values[0]          # (1, C, H, W)
    location_coords = location_coords[0]    # (1, 2)

    img = pixel_values[0]                   # (C, H, W)  NCHW, single image
    patches = _patchify(img).astype(jnp.bfloat16)         # (N, C*P*P)

    # location embedding: tiny 2->EMBED linear stays as glue (K=2 matmul).
    loc_emb = location_coords @ prep["w_loc"] + prep["b_loc"]   # (1, EMBED)
    # patch bias + pos embed + location embed folded into one operand.
    extras = prep["pos_plus_bias"] + loc_emb                    # (N, EMBED)
    # TODO(synk): no CLS token is prepended (real Prithvi adds and later drops one).

    logits_tok = encoder_forward(patches, extras, prep)         # (N, HEAD_OUT)

    # pixel-shuffle back to (1, NUM_CLASSES, H, W)
    x = logits_tok.reshape(GRID, GRID, NUM_CLASSES, PATCH, PATCH)
    x = jnp.transpose(x, (2, 0, 3, 1, 4)).reshape(NUM_CLASSES, IMG, IMG)
    # TODO(synk): real terratorch decoder uses a learned FCN/upsampling neck;
    # a linear head + pixel shuffle stands in here.
    return x[None]                          # (1, NUM_CLASSES, H, W)


# ------------------------------ weight init -----------------------------------
def init_params(key):
    scale = 0.02
    n_keys = 8 + DEPTH * 8
    ks = iter(jax.random.split(key, n_keys))

    def rnd(shape):
        return scale * jax.random.normal(next(ks), shape, jnp.float32)

    params = {
        "w_patch": rnd((PATCH_DIM, EMBED)),
        "b_patch": jnp.zeros((1, EMBED), jnp.float32),
        "pos_embed": rnd((NPATCH, EMBED)),
        "w_loc": rnd((2, EMBED)),
        "b_loc": jnp.zeros((1, EMBED), jnp.float32),
        "norm_g": jnp.ones((1, EMBED), jnp.float32),      # final encoder LN
        "norm_b": jnp.zeros((1, EMBED), jnp.float32),
        "w_head": rnd((EMBED, HEAD_OUT)),
        "b_head": jnp.zeros((1, HEAD_OUT), jnp.float32),
        "blocks": [],
    }
    for _ in range(DEPTH):
        params["blocks"].append({
            "ln1_g": jnp.ones((1, EMBED), jnp.float32),
            "ln1_b": jnp.zeros((1, EMBED), jnp.float32),
            "w_qkv": rnd((EMBED, 3 * EMBED)),
            "b_qkv": jnp.zeros((1, 3 * EMBED), jnp.float32),
            "w_o": rnd((EMBED, EMBED)),
            "b_o": jnp.zeros((1, EMBED), jnp.float32),
            "ln2_g": jnp.ones((1, EMBED), jnp.float32),
            "ln2_b": jnp.zeros((1, EMBED), jnp.float32),
            "w_mlp1": rnd((EMBED, MLP_DIM)),
            "b_mlp1": jnp.zeros((1, MLP_DIM), jnp.float32),
            "w_mlp2": rnd((MLP_DIM, EMBED)),
            "b_mlp2": jnp.zeros((1, EMBED), jnp.float32),
        })
    return params


def prepare_params(params):
    """Stack per-layer weights, fold 1/sqrt(head_dim) into the q columns of the
    flat (E, 3E) QKV weight/bias, cast matmul weights to bf16."""
    sm_scale = 1.0 / (HEAD_DIM ** 0.5)
    blocks = params["blocks"]

    def stack(name):
        return jnp.stack([b[name] for b in blocks], axis=0)

    def fold_scale(arr):   # scale the [Q | K | V]-layout q section
        return jnp.concatenate([arr[..., :EMBED] * sm_scale, arr[..., EMBED:]],
                               axis=-1)

    w_qkv = jnp.stack([fold_scale(b["w_qkv"]) for b in blocks], axis=0)
    b_qkv = jnp.stack([fold_scale(b["b_qkv"]) for b in blocks], axis=0)

    return {
        "w_patch": params["w_patch"].astype(jnp.bfloat16),
        "pos_plus_bias": params["pos_embed"] + params["b_patch"],
        "w_loc": params["w_loc"],
        "b_loc": params["b_loc"],
        "norm_g": params["norm_g"],
        "norm_b": params["norm_b"],
        "w_head": params["w_head"].astype(jnp.bfloat16),
        "b_head": params["b_head"],
        "ln1_g": stack("ln1_g"), "ln1_b": stack("ln1_b"),
        "w_qkv": w_qkv.astype(jnp.bfloat16),                  # (L, E, 3E)
        "b_qkv": b_qkv,                                       # (L, 1, 3E)
        "w_o": stack("w_o").astype(jnp.bfloat16),             # (L, E, E)
        "b_o": stack("b_o"),
        "ln2_g": stack("ln2_g"), "ln2_b": stack("ln2_b"),
        "w_mlp1": stack("w_mlp1").astype(jnp.bfloat16),       # (L, E, M)
        "b_mlp1": stack("b_mlp1"),
        "w_mlp2": stack("w_mlp2").astype(jnp.bfloat16),       # (L, M, E)
        "b_mlp2": stack("b_mlp2"),
    }


# ---------------------------------- main --------------------------------------
if __name__ == "__main__":
    key = jax.random.PRNGKey(0)
    k_params, k_pix = jax.random.split(key)

    params = init_params(k_params)
    prep = prepare_params(params)

    # kwargs-shaped inputs (mm batching adds a leading dim, unbound in forward)
    pixel_values = jax.random.normal(k_pix, (1, 1, CH, IMG, IMG), jnp.float32)
    location_coords = jnp.array([[[45.0, -93.0]]], jnp.float32)  # (1, 1, 2)

    fwd = jax.jit(prithvi_forward)
    out = fwd(pixel_values, location_coords, prep)
    out = jax.block_until_ready(out)

    assert out.shape == (1, NUM_CLASSES, IMG, IMG), out.shape
    assert out.dtype == jnp.float32
    assert bool(jnp.all(jnp.isfinite(out)))
    print("KERNEL_OK")
</pallas_src>

<mosaic_0001>
module attributes {stable_mosaic.version = 11 : i64} {
  func.func @_fused_kernel(%arg0: i32, %arg1: memref<16x384xbf16, #tpu.memory_space<vmem>>, %arg2: memref<384x128xbf16, #tpu.memory_space<vmem>>, %arg3: memref<16x128xf32, #tpu.memory_space<vmem>>, %arg4: memref<1x1x128xf32, #tpu.memory_space<vmem>>, %arg5: memref<1x1x128xf32, #tpu.memory_space<vmem>>, %arg6: memref<1x128x384xbf16, #tpu.memory_space<vmem>>, %arg7: memref<1x1x384xf32, #tpu.memory_space<vmem>>, %arg8: memref<1x128x128xbf16, #tpu.memory_space<vmem>>, %arg9: memref<1x1x128xf32, #tpu.memory_space<vmem>>, %arg10: memref<1x1x128xf32, #tpu.memory_space<vmem>>, %arg11: memref<1x1x128xf32, #tpu.memory_space<vmem>>, %arg12: memref<1x128x512xbf16, #tpu.memory_space<vmem>>, %arg13: memref<1x1x512xf32, #tpu.memory_space<vmem>>, %arg14: memref<1x512x128xbf16, #tpu.memory_space<vmem>>, %arg15: memref<1x1x128xf32, #tpu.memory_space<vmem>>, %arg16: memref<1x128xf32, #tpu.memory_space<vmem>>, %arg17: memref<1x128xf32, #tpu.memory_space<vmem>>, %arg18: memref<128x256xbf16, #tpu.memory_space<any>>, %arg19: memref<1x256xf32, #tpu.memory_space<vmem>>, %arg20: memref<16x256xf32, #tpu.memory_space<vmem>>, %arg21: memref<16x128xf32, #tpu.memory_space<vmem>>, %arg22: memref<128x256xbf16, #tpu.memory_space<vmem>>, %arg23: memref<1x!tpu.dma_semaphore, #tpu.memory_space<semaphore_mem>>) attributes {dimension_semantics = [#tpu.dimension_semantics<arbitrary>], iteration_bounds = array<i64: 2>, scalar_prefetch = 0 : i64, scratch_operands = 3 : i64, tpu.core_type = #tpu.core_type<tc>, window_params = [{pipeline_mode = #tpu.pipeline_mode<synchronous>, transform_indices = @transform_0, window_bounds = array<i64: 16, 384>}, {pipeline_mode = #tpu.pipeline_mode<synchronous>, transform_indices = @transform_1, window_bounds = array<i64: 384, 128>}, {pipeline_mode = #tpu.pipeline_mode<synchronous>, transform_indices = @transform_2, window_bounds = array<i64: 16, 128>}, {transform_indices = @transform_3, window_bounds = array<i64: 1, 1, 128>}, {transform_indices = @transform_4, window_bounds = array<i64: 1, 1, 128>}, {transform_indices = @transform_5, window_bounds = array<i64: 1, 128, 384>}, {transform_indices = @transform_6, window_bounds = array<i64: 1, 1, 384>}, {transform_indices = @transform_7, window_bounds = array<i64: 1, 128, 128>}, {transform_indices = @transform_8, window_bounds = array<i64: 1, 1, 128>}, {transform_indices = @transform_9, window_bounds = array<i64: 1, 1, 128>}, {transform_indices = @transform_10, window_bounds = array<i64: 1, 1, 128>}, {transform_indices = @transform_11, window_bounds = array<i64: 1, 128, 512>}, {transform_indices = @transform_12, window_bounds = array<i64: 1, 1, 512>}, {transform_indices = @transform_13, window_bounds = array<i64: 1, 512, 128>}, {transform_indices = @transform_14, window_bounds = array<i64: 1, 1, 128>}, {pipeline_mode = #tpu.pipeline_mode<synchronous>, transform_indices = @transform_15, window_bounds = array<i64: 1, 128>}, {pipeline_mode = #tpu.pipeline_mode<synchronous>, transform_indices = @transform_16, window_bounds = array<i64: 1, 128>}, {}, {pipeline_mode = #tpu.pipeline_mode<synchronous>, transform_indices = @transform_18, window_bounds = array<i64: 1, 256>}, {pipeline_mode = #tpu.pipeline_mode<synchronous>, transform_indices = @transform_19, window_bounds = array<i64: 16, 256>}]} {
    %c0_i32 = arith.constant 0 : i32
    %0 = arith.cmpi eq, %arg0, %c0_i32 : i32
    %1 = arith.extui %0 : i1 to i32
    %c0_i32_0 = arith.constant 0 : i32
    %2 = arith.cmpi ne, %1, %c0_i32_0 : i32
    scf.if %2 {
      %c0_i32_74 = arith.constant 0 : i32
      %188 = tpu.memref_slice %arg23[%c0_i32_74] : memref<1x!tpu.dma_semaphore, #tpu.memory_space<semaphore_mem>> -> memref<1x!tpu.dma_semaphore, #tpu.memory_space<semaphore_mem>>
      %189 = tpu.memref_squeeze %188 : memref<1x!tpu.dma_semaphore, #tpu.memory_space<semaphore_mem>> -> memref<!tpu.dma_semaphore, #tpu.memory_space<semaphore_mem>>
      tpu.enqueue_dma source(%arg18 : memref<128x256xbf16, #tpu.memory_space<any>>) target(%arg22 : memref<128x256xbf16, #tpu.memory_space<vmem>>) target_semaphore(%189 : memref<!tpu.dma_semaphore, #tpu.memory_space<semaphore_mem>>)
      %c0_75 = arith.constant 0 : index
      %c0_76 = arith.constant 0 : index
      %190 = vector.load %arg1[%c0_75, %c0_76] : memref<16x384xbf16, #tpu.memory_space<vmem>>, vector<16x384xbf16>
      %c0_77 = arith.constant 0 : index
      %c0_78 = arith.constant 0 : index
      %191 = vector.load %arg2[%c0_77, %c0_78] : memref<384x128xbf16, #tpu.memory_space<vmem>>, vector<384x128xbf16>
      %cst_79 = arith.constant dense<0.000000e+00> : vector<16x128xf32>
      %192 = tpu.matmul %190, %191, %cst_79 {dimension_numbers = #tpu.dot_dimension_numbers<[1], [0], [0], [1], [0, 0, 1, 1], [], []>} : vector<16x384xbf16>, vector<384x128xbf16>, vector<16x128xf32> -> vector<16x128xf32>
      %c0_80 = arith.constant 0 : index
      %c0_81 = arith.constant 0 : index
      %193 = vector.load %arg3[%c0_80, %c0_81] : memref<16x128xf32, #tpu.memory_space<vmem>>, vector<16x128xf32>
      %194 = arith.addf %192, %193 : vector<16x128xf32>
      %c0_82 = arith.constant 0 : index
      %c0_83 = arith.constant 0 : index
      %195 = vector.load %arg21[%c0_82, %c0_83] : memref<16x128xf32, #tpu.memory_space<vmem>>, vector<16x128xf32>
      tpu.vector_store %arg21[%c0_82, %c0_83], %194 {strides = array<i32>} : memref<16x128xf32, #tpu.memory_space<vmem>>, vector<16x128xf32>,
    } else {
    }
    %c0 = arith.constant 0 : index
    %c0_1 = arith.constant 0 : index
    %3 = vector.load %arg21[%c0, %c0_1] : memref<16x128xf32, #tpu.memory_space<vmem>>, vector<16x128xf32>
    %c0_2 = arith.constant 0 : index
    %c0_3 = arith.constant 0 : index
    %c0_4 = arith.constant 0 : index
    %4 = vector.load %arg4[%c0_2, %c0_3, %c0_4] : memref<1x1x128xf32, #tpu.memory_space<vmem>>, vector<1x1x128xf32>
    %5 = vector.shape_cast %4 : vector<1x1x128xf32> to vector<1x128xf32>
    %c0_5 = arith.constant 0 : index
    %c0_6 = arith.constant 0 : index
    %c0_7 = arith.constant 0 : index
    %6 = vector.load %arg5[%c0_5, %c0_6, %c0_7] : memref<1x1x128xf32, #tpu.memory_space<vmem>>, vector<1x1x128xf32>
    %7 = vector.shape_cast %6 : vector<1x1x128xf32> to vector<1x128xf32>
    %cst = arith.constant dense<0.000000e+00> : vector<16xf32>
    %8 = vector.multi_reduction <add>, %3, %cst [1] : vector<16x128xf32> to vector<16xf32>
    %9 = vector.shape_cast %8 : vector<16xf32> to vector<16x1xf32>
    %cst_8 = arith.constant 1.280000e+02 : f32
    %10 = vector.broadcast %cst_8 : f32 to vector<16x1xf32>
    %11 = arith.divf %9, %10 : vector<16x1xf32>
    %12 = arith.mulf %3, %3 : vector<16x128xf32>
    %cst_9 = arith.constant dense<0.000000e+00> : vector<16xf32>
    %13 = vector.multi_reduction <add>, %12, %cst_9 [1] : vector<16x128xf32> to vector<16xf32>
    %14 = vector.shape_cast %13 : vector<16xf32> to vector<16x1xf32>
    %cst_10 = arith.constant 1.280000e+02 : f32
    %15 = vector.broadcast %cst_10 : f32 to vector<16x1xf32>
    %16 = arith.divf %14, %15 : vector<16x1xf32>
    %17 = arith.mulf %11, %11 : vector<16x1xf32>
    %18 = arith.subf %16, %17 : vector<16x1xf32>
    %19 = vector.broadcast %11 : vector<16x1xf32> to vector<16x128xf32>
    %20 = arith.subf %3, %19 : vector<16x128xf32>
    %cst_11 = arith.constant 9.99999997E-7 : f32
    %21 = vector.broadcast %cst_11 : f32 to vector<16x1xf32>
    %22 = arith.addf %18, %21 : vector<16x1xf32>
    %23 = math.rsqrt %22 : vector<16x1xf32>
    %24 = vector.broadcast %23 : vector<16x1xf32> to vector<16x128xf32>
    %25 = arith.mulf %20, %24 : vector<16x128xf32>
    %26 = vector.broadcast %5 : vector<1x128xf32> to vector<16x128xf32>
    %27 = arith.mulf %25, %26 : vector<16x128xf32>
    %28 = vector.broadcast %7 : vector<1x128xf32> to vector<16x128xf32>
    %29 = arith.addf %27, %28 : vector<16x128xf32>
    %30 = arith.truncf %29 : vector<16x128xf32> to vector<16x128xbf16>
    %c0_12 = arith.constant 0 : index
    %c0_13 = arith.constant 0 : index
    %c0_14 = arith.constant 0 : index
    %31 = vector.load %arg6[%c0_12, %c0_13, %c0_14] : memref<1x128x384xbf16, #tpu.memory_space<vmem>>, vector<1x128x384xbf16>
    %32 = vector.shape_cast %31 : vector<1x128x384xbf16> to vector<128x384xbf16>
    %cst_15 = arith.constant dense<0.000000e+00> : vector<16x384xf32>
    %33 = tpu.matmul %30, %32, %cst_15 {dimension_numbers = #tpu.dot_dimension_numbers<[1], [0], [0], [1], [0, 0, 1, 1], [], []>} : vector<16x128xbf16>, vector<128x384xbf16>, vector<16x384xf32> -> vector<16x384xf32>
    %c0_16 = arith.constant 0 : index
    %c0_17 = arith.constant 0 : index
    %c0_18 = arith.constant 0 : index
    %34 = vector.load %arg7[%c0_16, %c0_17, %c0_18] : memref<1x1x384xf32, #tpu.memory_space<vmem>>, vector<1x1x384xf32>
    %35 = vector.shape_cast %34 : vector<1x1x384xf32> to vector<1x384xf32>
    %36 = vector.broadcast %35 : vector<1x384xf32> to vector<16x384xf32>
    %37 = arith.addf %33, %36 : vector<16x384xf32>
    %38 = vector.extract_strided_slice %37 {offsets = [0, 0], sizes = [16, 32], strides = [1, 1]} : vector<16x384xf32> to vector<16x32xf32>
    %39 = arith.truncf %38 : vector<16x32xf32> to vector<16x32xbf16>
    %40 = vector.extract_strided_slice %37 {offsets = [0, 128], sizes = [16, 32], strides = [1, 1]} : vector<16x384xf32> to vector<16x32xf32>
    %41 = arith.truncf %40 : vector<16x32xf32> to vector<16x32xbf16>
    %42 = vector.extract_strided_slice %37 {offsets = [0, 256], sizes = [16, 32], strides = [1, 1]} : vector<16x384xf32> to vector<16x32xf32>
    %43 = arith.truncf %42 : vector<16x32xf32> to vector<16x32xbf16>
    %44 = tpu.transpose %41, [1, 0] : vector<16x32xbf16> -> vector<32x16xbf16>
    %cst_19 = arith.constant dense<0.000000e+00> : vector<16x16xf32>
    %45 = tpu.matmul %39, %44, %cst_19 {dimension_numbers = #tpu.dot_dimension_numbers<[1], [0], [0], [1], [0, 0, 1, 1], [], []>} : vector<16x32xbf16>, vector<32x16xbf16>, vector<16x16xf32> -> vector<16x16xf32>
    %cst_20 = arith.constant dense<0xFF800000> : vector<16xf32>
    %46 = vector.multi_reduction <maximumf>, %45, %cst_20 [1] : vector<16x16xf32> to vector<16xf32>
    %47 = vector.shape_cast %46 : vector<16xf32> to vector<16x1xf32>
    %48 = vector.broadcast %47 : vector<16x1xf32> to vector<16x16xf32>
    %49 = arith.subf %45, %48 : vector<16x16xf32>
    %50 = math.exp %49 : vector<16x16xf32>
    %cst_21 = arith.constant dense<0.000000e+00> : vector<16xf32>
    %51 = vector.multi_reduction <add>, %50, %cst_21 [1] : vector<16x16xf32> to vector<16xf32>
    %52 = vector.shape_cast %51 : vector<16xf32> to vector<16x1xf32>
    %53 = tpu.reciprocal %52 {approx = true} : vector<16x1xf32> -> vector<16x1xf32>
    %54 = vector.broadcast %53 : vector<16x1xf32> to vector<16x16xf32>
    %55 = arith.mulf %50, %54 : vector<16x16xf32>
    %56 = arith.truncf %55 : vector<16x16xf32> to vector<16x16xbf16>
    %cst_22 = arith.constant dense<0.000000e+00> : vector<16x32xf32>
    %57 = tpu.matmul %56, %43, %cst_22 {dimension_numbers = #tpu.dot_dimension_numbers<[1], [0], [0], [1], [0, 0, 1, 1], [], []>} : vector<16x16xbf16>, vector<16x32xbf16>, vector<16x32xf32> -> vector<16x32xf32>
    %58 = vector.extract_strided_slice %37 {offsets = [0, 32], sizes = [16, 32], strides = [1, 1]} : vector<16x384xf32> to vector<16x32xf32>
    %59 = arith.truncf %58 : vector<16x32xf32> to vector<16x32xbf16>
    %60 = vector.extract_strided_slice %37 {offsets = [0, 160], sizes = [16, 32], strides = [1, 1]} : vector<16x384xf32> to vector<16x32xf32>
    %61 = arith.truncf %60 : vector<16x32xf32> to vector<16x32xbf16>
    %62 = vector.extract_strided_slice %37 {offsets = [0, 288], sizes = [16, 32], strides = [1, 1]} : vector<16x384xf32> to vector<16x32xf32>
    %63 = arith.truncf %62 : vector<16x32xf32> to vector<16x32xbf16>
    %64 = tpu.transpose %61, [1, 0] : vector<16x32xbf16> -> vector<32x16xbf16>
    %cst_23 = arith.constant dense<0.000000e+00> : vector<16x16xf32>
    %65 = tpu.matmul %59, %64, %cst_23 {dimension_numbers = #tpu.dot_dimension_numbers<[1], [0], [0], [1], [0, 0, 1, 1], [], []>} : vector<16x32xbf16>, vector<32x16xbf16>, vector<16x16xf32> -> vector<16x16xf32>
    %cst_24 = arith.constant dense<0xFF800000> : vector<16xf32>
    %66 = vector.multi_reduction <maximumf>, %65, %cst_24 [1] : vector<16x16xf32> to vector<16xf32>
    %67 = vector.shape_cast %66 : vector<16xf32> to vector<16x1xf32>
    %68 = vector.broadcast %67 : vector<16x1xf32> to vector<16x16xf32>
    %69 = arith.subf %65, %68 : vector<16x16xf32>
    %70 = math.exp %69 : vector<16x16xf32>
    %cst_25 = arith.constant dense<0.000000e+00> : vector<16xf32>
    %71 = vector.multi_reduction <add>, %70, %cst_25 [1] : vector<16x16xf32> to vector<16xf32>
    %72 = vector.shape_cast %71 : vector<16xf32> to vector<16x1xf32>
    %73 = tpu.reciprocal %72 {approx = true} : vector<16x1xf32> -> vector<16x1xf32>
    %74 = vector.broadcast %73 : vector<16x1xf32> to vector<16x16xf32>
    %75 = arith.mulf %70, %74 : vector<16x16xf32>
    %76 = arith.truncf %75 : vector<16x16xf32> to vector<16x16xbf16>
    %cst_26 = arith.constant dense<0.000000e+00> : vector<16x32xf32>
    %77 = tpu.matmul %76, %63, %cst_26 {dimension_numbers = #tpu.dot_dimension_numbers<[1], [0], [0], [1], [0, 0, 1, 1], [], []>} : vector<16x16xbf16>, vector<16x32xbf16>, vector<16x32xf32> -> vector<16x32xf32>
    %78 = vector.extract_strided_slice %37 {offsets = [0, 64], sizes = [16, 32], strides = [1, 1]} : vector<16x384xf32> to vector<16x32xf32>
    %79 = arith.truncf %78 : vector<16x32xf32> to vector<16x32xbf16>
    %80 = vector.extract_strided_slice %37 {offsets = [0, 192], sizes = [16, 32], strides = [1, 1]} : vector<16x384xf32> to vector<16x32xf32>
    %81 = arith.truncf %80 : vector<16x32xf32> to vector<16x32xbf16>
    %82 = vector.extract_strided_slice %37 {offsets = [0, 320], sizes = [16, 32], strides = [1, 1]} : vector<16x384xf32> to vector<16x32xf32>
    %83 = arith.truncf %82 : vector<16x32xf32> to vector<16x32xbf16>
    %84 = tpu.transpose %81, [1, 0] : vector<16x32xbf16> -> vector<32x16xbf16>
    %cst_27 = arith.constant dense<0.000000e+00> : vector<16x16xf32>
    %85 = tpu.matmul %79, %84, %cst_27 {dimension_numbers = #tpu.dot_dimension_numbers<[1], [0], [0], [1], [0, 0, 1, 1], [], []>} : vector<16x32xbf16>, vector<32x16xbf16>, vector<16x16xf32> -> vector<16x16xf32>
    %cst_28 = arith.constant dense<0xFF800000> : vector<16xf32>
    %86 = vector.multi_reduction <maximumf>, %85, %cst_28 [1] : vector<16x16xf32> to vector<16xf32>
    %87 = vector.shape_cast %86 : vector<16xf32> to vector<16x1xf32>
    %88 = vector.broadcast %87 : vector<16x1xf32> to vector<16x16xf32>
    %89 = arith.subf %85, %88 : vector<16x16xf32>
    %90 = math.exp %89 : vector<16x16xf32>
    %cst_29 = arith.constant dense<0.000000e+00> : vector<16xf32>
    %91 = vector.multi_reduction <add>, %90, %cst_29 [1] : vector<16x16xf32> to vector<16xf32>
    %92 = vector.shape_cast %91 : vector<16xf32> to vector<16x1xf32>
    %93 = tpu.reciprocal %92 {approx = true} : vector<16x1xf32> -> vector<16x1xf32>
    %94 = vector.broadcast %93 : vector<16x1xf32> to vector<16x16xf32>
    %95 = arith.mulf %90, %94 : vector<16x16xf32>
    %96 = arith.truncf %95 : vector<16x16xf32> to vector<16x16xbf16>
    %cst_30 = arith.constant dense<0.000000e+00> : vector<16x32xf32>
    %97 = tpu.matmul %96, %83, %cst_30 {dimension_numbers = #tpu.dot_dimension_numbers<[1], [0], [0], [1], [0, 0, 1, 1], [], []>} : vector<16x16xbf16>, vector<16x32xbf16>, vector<16x32xf32> -> vector<16x32xf32>
    %98 = vector.extract_strided_slice %37 {offsets = [0, 96], sizes = [16, 32], strides = [1, 1]} : vector<16x384xf32> to vector<16x32xf32>
    %99 = arith.truncf %98 : vector<16x32xf32> to vector<16x32xbf16>
    %100 = vector.extract_strided_slice %37 {offsets = [0, 224], sizes = [16, 32], strides = [1, 1]} : vector<16x384xf32> to vector<16x32xf32>
    %101 = arith.truncf %100 : vector<16x32xf32> to vector<16x32xbf16>
    %102 = vector.extract_strided_slice %37 {offsets = [0, 352], sizes = [16, 32], strides = [1, 1]} : vector<16x384xf32> to vector<16x32xf32>
    %103 = arith.truncf %102 : vector<16x32xf32> to vector<16x32xbf16>
    %104 = tpu.transpose %101, [1, 0] : vector<16x32xbf16> -> vector<32x16xbf16>
    %cst_31 = arith.constant dense<0.000000e+00> : vector<16x16xf32>
    %105 = tpu.matmul %99, %104, %cst_31 {dimension_numbers = #tpu.dot_dimension_numbers<[1], [0], [0], [1], [0, 0, 1, 1], [], []>} : vector<16x32xbf16>, vector<32x16xbf16>, vector<16x16xf32> -> vector<16x16xf32>
    %cst_32 = arith.constant dense<0xFF800000> : vector<16xf32>
    %106 = vector.multi_reduction <maximumf>, %105, %cst_32 [1] : vector<16x16xf32> to vector<16xf32>
    %107 = vector.shape_cast %106 : vector<16xf32> to vector<16x1xf32>
    %108 = vector.broadcast %107 : vector<16x1xf32> to vector<16x16xf32>
    %109 = arith.subf %105, %108 : vector<16x16xf32>
    %110 = math.exp %109 : vector<16x16xf32>
    %cst_33 = arith.constant dense<0.000000e+00> : vector<16xf32>
    %111 = vector.multi_reduction <add>, %110, %cst_33 [1] : vector<16x16xf32> to vector<16xf32>
    %112 = vector.shape_cast %111 : vector<16xf32> to vector<16x1xf32>
    %113 = tpu.reciprocal %112 {approx = true} : vector<16x1xf32> -> vector<16x1xf32>
    %114 = vector.broadcast %113 : vector<16x1xf32> to vector<16x16xf32>
    %115 = arith.mulf %110, %114 : vector<16x16xf32>
    %116 = arith.truncf %115 : vector<16x16xf32> to vector<16x16xbf16>
    %cst_34 = arith.constant dense<0.000000e+00> : vector<16x32xf32>
    %117 = tpu.matmul %116, %103, %cst_34 {dimension_numbers = #tpu.dot_dimension_numbers<[1], [0], [0], [1], [0, 0, 1, 1], [], []>} : vector<16x16xbf16>, vector<16x32xbf16>, vector<16x32xf32> -> vector<16x32xf32>
    %118 = tpu.concatenate %57, %77, %97, %117 in 1 : vector<16x32xf32>, vector<16x32xf32>, vector<16x32xf32>, vector<16x32xf32> -> vector<16x128xf32>
    %119 = arith.truncf %118 : vector<16x128xf32> to vector<16x128xbf16>
    %c0_35 = arith.constant 0 : index
    %c0_36 = arith.constant 0 : index
    %c0_37 = arith.constant 0 : index
    %120 = vector.load %arg8[%c0_35, %c0_36, %c0_37] : memref<1x128x128xbf16, #tpu.memory_space<vmem>>, vector<1x128x128xbf16>
    %121 = vector.shape_cast %120 : vector<1x128x128xbf16> to vector<128x128xbf16>
    %cst_38 = arith.constant dense<0.000000e+00> : vector<16x128xf32>
    %122 = tpu.matmul %119, %121, %cst_38 {dimension_numbers = #tpu.dot_dimension_numbers<[1], [0], [0], [1], [0, 0, 1, 1], [], []>} : vector<16x128xbf16>, vector<128x128xbf16>, vector<16x128xf32> -> vector<16x128xf32>
    %123 = arith.addf %3, %122 : vector<16x128xf32>
    %c0_39 = arith.constant 0 : index
    %c0_40 = arith.constant 0 : index
    %c0_41 = arith.constant 0 : index
    %124 = vector.load %arg9[%c0_39, %c0_40, %c0_41] : memref<1x1x128xf32, #tpu.memory_space<vmem>>, vector<1x1x128xf32>
    %125 = vector.shape_cast %124 : vector<1x1x128xf32> to vector<1x128xf32>
    %126 = vector.broadcast %125 : vector<1x128xf32> to vector<16x128xf32>
    %127 = arith.addf %123, %126 : vector<16x128xf32>
    %c0_42 = arith.constant 0 : index
    %c0_43 = arith.constant 0 : index
    %c0_44 = arith.constant 0 : index
    %128 = vector.load %arg10[%c0_42, %c0_43, %c0_44] : memref<1x1x128xf32, #tpu.memory_space<vmem>>, vector<1x1x128xf32>
    %129 = vector.shape_cast %128 : vector<1x1x128xf32> to vector<1x128xf32>
    %c0_45 = arith.constant 0 : index
    %c0_46 = arith.constant 0 : index
    %c0_47 = arith.constant 0 : index
    %130 = vector.load %arg11[%c0_45, %c0_46, %c0_47] : memref<1x1x128xf32, #tpu.memory_space<vmem>>, vector<1x1x128xf32>
    %131 = vector.shape_cast %130 : vector<1x1x128xf32> to vector<1x128xf32>
    %cst_48 = arith.constant dense<0.000000e+00> : vector<16xf32>
    %132 = vector.multi_reduction <add>, %127, %cst_48 [1] : vector<16x128xf32> to vector<16xf32>
    %133 = vector.shape_cast %132 : vector<16xf32> to vector<16x1xf32>
    %cst_49 = arith.constant 1.280000e+02 : f32
    %134 = vector.broadcast %cst_49 : f32 to vector<16x1xf32>
    %135 = arith.divf %133, %134 : vector<16x1xf32>
    %136 = arith.mulf %127, %127 : vector<16x128xf32>
    %cst_50 = arith.constant dense<0.000000e+00> : vector<16xf32>
    %137 = vector.multi_reduction <add>, %136, %cst_50 [1] : vector<16x128xf32> to vector<16xf32>
    %138 = vector.shape_cast %137 : vector<16xf32> to vector<16x1xf32>
    %cst_51 = arith.constant 1.280000e+02 : f32
    %139 = vector.broadcast %cst_51 : f32 to vector<16x1xf32>
    %140 = arith.divf %138, %139 : vector<16x1xf32>
    %141 = arith.mulf %135, %135 : vector<16x1xf32>
    %142 = arith.subf %140, %141 : vector<16x1xf32>
    %143 = vector.broadcast %135 : vector<16x1xf32> to vector<16x128xf32>
    %144 = arith.subf %127, %143 : vector<16x128xf32>
    %cst_52 = arith.constant 9.99999997E-7 : f32
    %145 = vector.broadcast %cst_52 : f32 to vector<16x1xf32>
    %146 = arith.addf %142, %145 : vector<16x1xf32>
    %147 = math.rsqrt %146 : vector<16x1xf32>
    %148 = vector.broadcast %147 : vector<16x1xf32> to vector<16x128xf32>
    %149 = arith.mulf %144, %148 : vector<16x128xf32>
    %150 = vector.broadcast %129 : vector<1x128xf32> to vector<16x128xf32>
    %151 = arith.mulf %149, %150 : vector<16x128xf32>
    %152 = vector.broadcast %131 : vector<1x128xf32> to vector<16x128xf32>
    %153 = arith.addf %151, %152 : vector<16x128xf32>
    %154 = arith.truncf %153 : vector<16x128xf32> to vector<16x128xbf16>
    %c0_53 = arith.constant 0 : index
    %c0_54 = arith.constant 0 : index
    %c0_55 = arith.constant 0 : index
    %155 = vector.load %arg12[%c0_53, %c0_54, %c0_55] : memref<1x128x512xbf16, #tpu.memory_space<vmem>>, vector<1x128x512xbf16>
    %156 = vector.shape_cast %155 : vector<1x128x512xbf16> to vector<128x512xbf16>
    %cst_56 = arith.constant dense<0.000000e+00> : vector<16x512xf32>
    %157 = tpu.matmul %154, %156, %cst_56 {dimension_numbers = #tpu.dot_dimension_numbers<[1], [0], [0], [1], [0, 0, 1, 1], [], []>} : vector<16x128xbf16>, vector<128x512xbf16>, vector<16x512xf32> -> vector<16x512xf32>
    %c0_57 = arith.constant 0 : index
    %c0_58 = arith.constant 0 : index
    %c0_59 = arith.constant 0 : index
    %158 = vector.load %arg13[%c0_57, %c0_58, %c0_59] : memref<1x1x512xf32, #tpu.memory_space<vmem>>, vector<1x1x512xf32>
    %159 = vector.shape_cast %158 : vector<1x1x512xf32> to vector<1x512xf32>
    %160 = vector.broadcast %159 : vector<1x512xf32> to vector<16x512xf32>
    %161 = arith.addf %157, %160 : vector<16x512xf32>
    %162 = arith.mulf %161, %161 : vector<16x512xf32>
    %163 = arith.mulf %161, %162 : vector<16x512xf32>
    %cst_60 = arith.constant 4.471500e-02 : f32
    %164 = vector.broadcast %cst_60 : f32 to vector<16x512xf32>
    %165 = arith.mulf %164, %163 : vector<16x512xf32>
    %166 = arith.addf %161, %165 : vector<16x512xf32>
    %cst_61 = arith.constant 0.797884583 : f32
    %167 = vector.broadcast %cst_61 : f32 to vector<16x512xf32>
    %168 = arith.mulf %167, %166 : vector<16x512xf32>
    %169 = math.tanh %168 : vector<16x512xf32>
    %cst_62 = arith.constant 1.000000e+00 : f32
    %170 = vector.broadcast %cst_62 : f32 to vector<16x512xf32>
    %171 = arith.addf %170, %169 : vector<16x512xf32>
    %cst_63 = arith.constant 5.000000e-01 : f32
    %172 = vector.broadcast %cst_63 : f32 to vector<16x512xf32>
    %173 = arith.mulf %172, %171 : vector<16x512xf32>
    %174 = arith.mulf %161, %173 : vector<16x512xf32>
    %175 = arith.truncf %174 : vector<16x512xf32> to vector<16x512xbf16>
    %c0_64 = arith.constant 0 : index
    %c0_65 = arith.constant 0 : index
    %c0_66 = arith.constant 0 : index
    %176 = vector.load %arg14[%c0_64, %c0_65, %c0_66] : memref<1x512x128xbf16, #tpu.memory_space<vmem>>, vector<1x512x128xbf16>
    %177 = vector.shape_cast %176 : vector<1x512x128xbf16> to vector<512x128xbf16>
    %cst_67 = arith.constant dense<0.000000e+00> : vector<16x128xf32>
    %178 = tpu.matmul %175, %177, %cst_67 {dimension_numbers = #tpu.dot_dimension_numbers<[1], [0], [0], [1], [0, 0, 1, 1], [], []>} : vector<16x512xbf16>, vector<512x128xbf16>, vector<16x128xf32> -> vector<16x128xf32>
    %179 = arith.addf %127, %178 : vector<16x128xf32>
    %c0_68 = arith.constant 0 : index
    %c0_69 = arith.constant 0 : index
    %c0_70 = arith.constant 0 : index
    %180 = vector.load %arg15[%c0_68, %c0_69, %c0_70] : memref<1x1x128xf32, #tpu.memory_space<vmem>>, vector<1x1x128xf32>
    %181 = vector.shape_cast %180 : vector<1x1x128xf32> to vector<1x128xf32>
    %182 = vector.broadcast %181 : vector<1x128xf32> to vector<16x128xf32>
    %183 = arith.addf %179, %182 : vector<16x128xf32>
    %c0_71 = arith.constant 0 : index
    %c0_72 = arith.constant 0 : index
    %184 = vector.load %arg21[%c0_71, %c0_72] : memref<16x128xf32, #tpu.memory_space<vmem>>, vector<16x128xf32>
    tpu.vector_store %arg21[%c0_71, %c0_72], %183 {strides = array<i32>} : memref<16x128xf32, #tpu.memory_space<vmem>>, vector<16x128xf32>,
    %c1_i32 = arith.constant 1 : i32
    %185 = arith.cmpi eq, %arg0, %c1_i32 : i32
    %186 = arith.extui %185 : i1 to i32
    %c0_i32_73 = arith.constant 0 : i32
    %187 = arith.cmpi ne, %186, %c0_i32_73 : i32
    scf.if %187 {
      %c0_i32_74 = arith.constant 0 : i32
      %188 = tpu.memref_slice %arg23[%c0_i32_74] : memref<1x!tpu.dma_semaphore, #tpu.memory_space<semaphore_mem>> -> memref<1x!tpu.dma_semaphore, #tpu.memory_space<semaphore_mem>>
      %189 = tpu.memref_squeeze %188 : memref<1x!tpu.dma_semaphore, #tpu.memory_space<semaphore_mem>> -> memref<!tpu.dma_semaphore, #tpu.memory_space<semaphore_mem>>
      tpu.wait_dma2 semaphore(%189 : memref<!tpu.dma_semaphore, #tpu.memory_space<semaphore_mem>>) src(%arg18 : memref<128x256xbf16, #tpu.memory_space<any>>) dst(%arg22 : memref<128x256xbf16, #tpu.memory_space<vmem>>)
      %c0_75 = arith.constant 0 : index
      %c0_76 = arith.constant 0 : index
      %190 = vector.load %arg16[%c0_75, %c0_76] : memref<1x128xf32, #tpu.memory_space<vmem>>, vector<1x128xf32>
      %c0_77 = arith.constant 0 : index
      %c0_78 = arith.constant 0 : index
      %191 = vector.load %arg17[%c0_77, %c0_78] : memref<1x128xf32, #tpu.memory_space<vmem>>, vector<1x128xf32>
      %cst_79 = arith.constant dense<0.000000e+00> : vector<16xf32>
      %192 = vector.multi_reduction <add>, %183, %cst_79 [1] : vector<16x128xf32> to vector<16xf32>
      %193 = vector.shape_cast %192 : vector<16xf32> to vector<16x1xf32>
      %cst_80 = arith.constant 1.280000e+02 : f32
      %194 = vector.broadcast %cst_80 : f32 to vector<16x1xf32>
      %195 = arith.divf %193, %194 : vector<16x1xf32>
      %196 = arith.mulf %183, %183 : vector<16x128xf32>
      %cst_81 = arith.constant dense<0.000000e+00> : vector<16xf32>
      %197 = vector.multi_reduction <add>, %196, %cst_81 [1] : vector<16x128xf32> to vector<16xf32>
      %198 = vector.shape_cast %197 : vector<16xf32> to vector<16x1xf32>
      %cst_82 = arith.constant 1.280000e+02 : f32
      %199 = vector.broadcast %cst_82 : f32 to vector<16x1xf32>
      %200 = arith.divf %198, %199 : vector<16x1xf32>
      %201 = arith.mulf %195, %195 : vector<16x1xf32>
      %202 = arith.subf %200, %201 : vector<16x1xf32>
      %203 = vector.broadcast %195 : vector<16x1xf32> to vector<16x128xf32>
      %204 = arith.subf %183, %203 : vector<16x128xf32>
      %cst_83 = arith.constant 9.99999997E-7 : f32
      %205 = vector.broadcast %cst_83 : f32 to vector<16x1xf32>
      %206 = arith.addf %202, %205 : vector<16x1xf32>
      %207 = math.rsqrt %206 : vector<16x1xf32>
      %208 = vector.broadcast %207 : vector<16x1xf32> to vector<16x128xf32>
      %209 = arith.mulf %204, %208 : vector<16x128xf32>
      %210 = vector.broadcast %190 : vector<1x128xf32> to vector<16x128xf32>
      %211 = arith.mulf %209, %210 : vector<16x128xf32>
      %212 = vector.broadcast %191 : vector<1x128xf32> to vector<16x128xf32>
      %213 = arith.addf %211, %212 : vector<16x128xf32>
      %214 = arith.truncf %213 : vector<16x128xf32> to vector<16x128xbf16>
      %c0_84 = arith.constant 0 : index
      %c0_85 = arith.constant 0 : index
      %215 = vector.load %arg22[%c0_84, %c0_85] : memref<128x256xbf16, #tpu.memory_space<vmem>>, vector<128x256xbf16>
      %cst_86 = arith.constant dense<0.000000e+00> : vector<16x256xf32>
      %216 = tpu.matmul %214, %215, %cst_86 {dimension_numbers = #tpu.dot_dimension_numbers<[1], [0], [0], [1], [0, 0, 1, 1], [], []>} : vector<16x128xbf16>, vector<128x256xbf16>, vector<16x256xf32> -> vector<16x256xf32>
      %c0_87 = arith.constant 0 : index
      %c0_88 = arith.constant 0 : index
      %217 = vector.load %arg19[%c0_87, %c0_88] : memref<1x256xf32, #tpu.memory_space<vmem>>, vector<1x256xf32>
      %218 = vector.broadcast %217 : vector<1x256xf32> to vector<16x256xf32>
      %219 = arith.addf %216, %218 : vector<16x256xf32>
      %c0_89 = arith.constant 0 : index
      %c0_90 = arith.constant 0 : index
      %220 = vector.load %arg20[%c0_89, %c0_90] : memref<16x256xf32, #tpu.memory_space<vmem>>, vector<16x256xf32>
      tpu.vector_store %arg20[%c0_89, %c0_90], %219 {strides = array<i32>} : memref<16x256xf32, #tpu.memory_space<vmem>>, vector<16x256xf32>,
    } else {
    }
    return
  }
  func.func @transform_0(%arg0: i32) -> (i32, i32) {
    %c0_i32 = arith.constant 0 : i32
    %c0_i32_0 = arith.constant 0 : i32
    %c0_i32_1 = arith.constant 0 : i32
    return %c0_i32, %c0_i32_0 : i32, i32
  }
  func.func @transform_1(%arg0: i32) -> (i32, i32) {
    %c0_i32 = arith.constant 0 : i32
    %c0_i32_0 = arith.constant 0 : i32
    %c0_i32_1 = arith.constant 0 : i32
    return %c0_i32, %c0_i32_0 : i32, i32
  }
  func.func @transform_2(%arg0: i32) -> (i32, i32) {
    %c0_i32 = arith.constant 0 : i32
    %c0_i32_0 = arith.constant 0 : i32
    %c0_i32_1 = arith.constant 0 : i32
    return %c0_i32, %c0_i32_0 : i32, i32
  }
  func.func @transform_3(%arg0: i32) -> (i32, i32, i32) {
    %c0_i32 = arith.constant 0 : i32
    %c0_i32_0 = arith.constant 0 : i32
    %c0_i32_1 = arith.constant 0 : i32
    return %arg0, %c0_i32, %c0_i32_0 : i32, i32, i32
  }
  func.func @transform_4(%arg0: i32) -> (i32, i32, i32) {
    %c0_i32 = arith.constant 0 : i32
    %c0_i32_0 = arith.constant 0 : i32
    %c0_i32_1 = arith.constant 0 : i32
    return %arg0, %c0_i32, %c0_i32_0 : i32, i32, i32
  }
  func.func @transform_5(%arg0: i32) -> (i32, i32, i32) {
    %c0_i32 = arith.constant 0 : i32
    %c0_i32_0 = arith.constant 0 : i32
    %c0_i32_1 = arith.constant 0 : i32
    return %arg0, %c0_i32, %c0_i32_0 : i32, i32, i32
  }
  func.func @transform_6(%arg0: i32) -> (i32, i32, i32) {
    %c0_i32 = arith.constant 0 : i32
    %c0_i32_0 = arith.constant 0 : i32
    %c0_i32_1 = arith.constant 0 : i32
    return %arg0, %c0_i32, %c0_i32_0 : i32, i32, i32
  }
  func.func @transform_7(%arg0: i32) -> (i32, i32, i32) {
    %c0_i32 = arith.constant 0 : i32
    %c0_i32_0 = arith.constant 0 : i32
    %c0_i32_1 = arith.constant 0 : i32
    return %arg0, %c0_i32, %c0_i32_0 : i32, i32, i32
  }
  func.func @transform_8(%arg0: i32) -> (i32, i32, i32) {
    %c0_i32 = arith.constant 0 : i32
    %c0_i32_0 = arith.constant 0 : i32
    %c0_i32_1 = arith.constant 0 : i32
    return %arg0, %c0_i32, %c0_i32_0 : i32, i32, i32
  }
  func.func @transform_9(%arg0: i32) -> (i32, i32, i32) {
    %c0_i32 = arith.constant 0 : i32
    %c0_i32_0 = arith.constant 0 : i32
    %c0_i32_1 = arith.constant 0 : i32
    return %arg0, %c0_i32, %c0_i32_0 : i32, i32, i32
  }
  func.func @transform_10(%arg0: i32) -> (i32, i32, i32) {
    %c0_i32 = arith.constant 0 : i32
    %c0_i32_0 = arith.constant 0 : i32
    %c0_i32_1 = arith.constant 0 : i32
    return %arg0, %c0_i32, %c0_i32_0 : i32, i32, i32
  }
  func.func @transform_11(%arg0: i32) -> (i32, i32, i32) {
    %c0_i32 = arith.constant 0 : i32
    %c0_i32_0 = arith.constant 0 : i32
    %c0_i32_1 = arith.constant 0 : i32
    return %arg0, %c0_i32, %c0_i32_0 : i32, i32, i32
  }
  func.func @transform_12(%arg0: i32) -> (i32, i32, i32) {
    %c0_i32 = arith.constant 0 : i32
    %c0_i32_0 = arith.constant 0 : i32
    %c0_i32_1 = arith.constant 0 : i32
    return %arg0, %c0_i32, %c0_i32_0 : i32, i32, i32
  }
  func.func @transform_13(%arg0: i32) -> (i32, i32, i32) {
    %c0_i32 = arith.constant 0 : i32
    %c0_i32_0 = arith.constant 0 : i32
    %c0_i32_1 = arith.constant 0 : i32
    return %arg0, %c0_i32, %c0_i32_0 : i32, i32, i32
  }
  func.func @transform_14(%arg0: i32) -> (i32, i32, i32) {
    %c0_i32 = arith.constant 0 : i32
    %c0_i32_0 = arith.constant 0 : i32
    %c0_i32_1 = arith.constant 0 : i32
    return %arg0, %c0_i32, %c0_i32_0 : i32, i32, i32
  }
  func.func @transform_15(%arg0: i32) -> (i32, i32) {
    %c0_i32 = arith.constant 0 : i32
    %c0_i32_0 = arith.constant 0 : i32
    %c0_i32_1 = arith.constant 0 : i32
    return %c0_i32, %c0_i32_0 : i32, i32
  }
  func.func @transform_16(%arg0: i32) -> (i32, i32) {
    %c0_i32 = arith.constant 0 : i32
    %c0_i32_0 = arith.constant 0 : i32
    %c0_i32_1 = arith.constant 0 : i32
    return %c0_i32, %c0_i32_0 : i32, i32
  }
  func.func @transform_18(%arg0: i32) -> (i32, i32) {
    %c0_i32 = arith.constant 0 : i32
    %c0_i32_0 = arith.constant 0 : i32
    %c0_i32_1 = arith.constant 0 : i32
    return %c0_i32, %c0_i32_0 : i32, i32
  }
  func.func @transform_19(%arg0: i32) -> (i32, i32) {
    %c0_i32 = arith.constant 0 : i32
    %c0_i32_0 = arith.constant 0 : i32
    %c0_i32_1 = arith.constant 0 : i32
    return %c0_i32, %c0_i32_0 : i32, i32
  }
}

</mosaic_0001>

<bundles_post_ra>
// kernel: prithvi_forward.1
= control target key start
LH: loop header
LB: loop body
LE: loop exit
PB: predicated region body
PF: predicated region fallthrough
CT: control target
= control target key end

     0   :  { %s4569_s0 = inlined_call_operand.vmem [shape: bf16[16,384], index: 0, kind: input, shape index: {}]   ;;  %s4570_s1 = inlined_call_operand.vmem [shape: bf16[384,128], index: 1, kind: input, shape index: {}]   ;;  %s4571_s2 = inlined_call_operand.vmem [shape: f32[16,128], index: 2, kind: input, shape index: {}]   ;;  %s4572_s3 = inlined_call_operand.vmem [shape: f32[2,1,128], index: 3, kind: input, shape index: {}]   ;;  %s4573_s4 = inlined_call_operand.vmem [shape: f32[2,1,128], index: 4, kind: input, shape index: {}]   ;;  %s4574_s5 = inlined_call_operand.vmem [shape: bf16[2,128,384], index: 5, kind: input, shape index: {}]   ;;  %s4575_s6 = inlined_call_operand.vmem [shape: f32[2,1,384], index: 6, kind: input, shape index: {}]   ;;  %s4576_s7 = inlined_call_operand.vmem [shape: bf16[2,128,128], index: 7, kind: input, shape index: {}]   ;;  %s4577_s8 = inlined_call_operand.vmem [shape: f32[2,1,128], index: 8, kind: input, shape index: {}]   ;;  %s4578_s9 = inlined_call_operand.vmem [shape: f32[2,1,128], index: 9, kind: input, shape index: {}]   ;;  %s4579_s10 = inlined_call_operand.vmem [shape: f32[2,1,128], index: 10, kind: input, shape index: {}]   ;;  %s4580_s11 = inlined_call_operand.vmem [shape: bf16[2,128,512], index: 11, kind: input, shape index: {}]   ;;  %s4581_s12 = inlined_call_operand.vmem [shape: f32[2,1,512], index: 12, kind: input, shape index: {}]   ;;  %s4582_s13 = inlined_call_operand.vmem [shape: bf16[2,512,128], index: 13, kind: input, shape index: {}]   ;;  %s4583_s14 = inlined_call_operand.vmem [shape: f32[2,1,128], index: 14, kind: input, shape index: {}]   ;;  %s4584_s15 = inlined_call_operand.vmem [shape: f32[1,128], index: 15, kind: input, shape index: {}]   ;;  %s4585_s16 = inlined_call_operand.vmem [shape: f32[1,128], index: 16, kind: input, shape index: {}]   ;;  %s4586_s17 = inlined_call_operand.vmem [shape: bf16[128,256], index: 17, kind: input, shape index: {}]   ;;  %s4587_s18 = inlined_call_operand.vmem [shape: f32[1,256], index: 18, kind: input, shape index: {}]   ;;  %s4588_s19 = inlined_call_operand.vmem [shape: f32[16,256], index: 19, kind: output, shape index: {}]  }
   0x1   :  { %4594 = sst [smem:[#allocation8_spill]] %s4569_s0  ;;  %s3963_s0 = smov 0  }
   0x2   :  { %4595 = sst [smem:[#allocation9_spill]] %s4570_s1 }
   0x3   :  { %4596 = sst [smem:[#allocation10_spill]] %s4571_s2 }
   0x4   :  { %4597 = sst [smem:[#allocation11_spill]] %s4572_s3 }
   0x5   :  { %4598 = sst [smem:[#allocation12_spill]] %s4574_s5 }
   0x6   :  { %4599 = sst [smem:[#allocation13_spill]] %s4576_s7 }
   0x7   :  { %4600 = sst [smem:[#allocation14_spill]] %s4584_s15 }
   0x8   :  { %4601 = sst [smem:[#allocation15_spill]] %s4585_s16 }
   0x9   :  { %4602 = sst [smem:[#allocation16_spill]] %s4587_s18 }
   0xa   :  { %4603 = sst [smem:[#allocation17_spill]] %s4588_s19 }
   0xb LB: > { %4604 = sst [smem:[#allocation7_spill]] %s3852_s0  ;;  %s3969_s30 = sadd.s32 4294967295, %s3852_s0   ;;  %s3852_s0 = sphi %s3963_s0, %s29_s0  }
   0xc   : > { %p3227_p0 = scmp.ge.s32.totalorder %s3852_s0, 1  ;;  %p604_p1 = scmp.lt.s32.totalorder %s3852_s0, 3 }
   0xe   : > { %p605_p2 = pnand %p3227_p0, %p604_p1 }
   0xf   : > { %p694_p3 = scmp.lt.s32.totalorder (!%p605_p2), %s3969_s30, 1  ;;  %s4606_s7 = sld [smem:[#allocation13_spill]] (!%p605_p2) }
  0x10   : > { %608 = sbr.rel (%p605_p2) target bundleno = 3397 (0xd45), region = 92  ;;  %s4607_s5 = sld [smem:[#allocation12_spill]] (!%p605_p2) }
  0x11   : > { %p3236_p4 = scmp.ne.s32.totalorder (!%p605_p2), %s3969_s30, 0 }
  0x17   : > { %s3975_s20 = scalar_select %p694_p3, %s3969_s30, 1 }
  0x18   : > { %744 = sbr.rel (%p3236_p4) target bundleno = 301 (0x12d), region = 96  ;;  %v762_v0 = vld [vmem:[%s4586_s17] sm:$0xf] (!%p3236_p4)  ;;  %v764_v1 = vld [vmem:[%s4586_s17 + $0x8] sm:$0xf] (!%p3236_p4)  ;;  %v768_v3 = vld [vmem:[%s4586_s17 + $0xc] sm:$0xff] (!%p3236_p4)  }
  0x19   : > { %s3600_s3 = smul.u32 192, %s3975_s20  ;;  %s3380_s26 = sshll.u32 %s3975_s20, 6  ;;  %v766_v2 = vld [vmem:[%s4586_s17 + $0x4] sm:$0xf] (!%p3236_p4)  ;;  %763 = vst [vmem:[#allocation3] sm:$0xf] (!%p3236_p4), %v762_v0 }
  0x1a   : > { %s3601_s27 = smul.u32 3, %s3975_s20  ;;  %s3991_s21 = scalar_lea.vmem %s4606_s7, %s3380_s26  ;;  %765 = vst [vmem:[#allocation3 + $0x4] sm:$0xf] (!%p3236_p4), %v764_v1  ;;  %767 = vst [vmem:[#allocation3 + $0x8] sm:$0xf] (!%p3236_p4), %v766_v2  ;;  %v776_v6 = vld [vmem:[%s4586_s17 + $0x1c] sm:$0xff] (!%p3236_p4)  }
  0x1b   : > { %s3996_s19 = scalar_lea.vmem %s4607_s5, %s3600_s3  ;;  %s719_s28 = scalar_lea.vmem %s4578_s9, %s3975_s20  ;;  %v772_v4 = vld [vmem:[%s4586_s17 + $0x18] sm:$0xf] (!%p3236_p4)  ;;  %v774_v5 = vld [vmem:[%s4586_s17 + $0x14] sm:$0xf] (!%p3236_p4)  ;;  %769 = vst [vmem:[#allocation3 + $0xc] sm:$0xff] (!%p3236_p4), %v768_v3   ;;  %777 = vst [vmem:[#allocation3 + $0x1c] sm:$0xff] (!%p3236_p4), %v776_v6  }
  0x1c   : > { %s4005_s25 = scalar_lea.vmem %s4575_s6, %s3601_s27  ;;  %s3381_s0 = sshll.u32 %s3975_s20, 8  ;;  %773 = vst [vmem:[#allocation3 + $0x14] sm:$0xf] (!%p3236_p4), %v772_v4  ;;  %775 = vst [vmem:[#allocation3 + $0x18] sm:$0xf] (!%p3236_p4), %v774_v5  ;;  %v784_v9 = vld [vmem:[%s4586_s17 + $0x2c] sm:$0xff] (!%p3236_p4)  }
  0x1d   : > { %s4019_s5 = scalar_lea.vmem %s4580_s11, %s3381_s0  ;;  %s3233_s18 = sshll.u32 %s3975_s20, 2  ;;  %v780_v7 = vld [vmem:[%s4586_s17 + $0x28] sm:$0xf] (!%p3236_p4)  ;;  %v782_v8 = vld [vmem:[%s4586_s17 + $0x24] sm:$0xf] (!%p3236_p4)  ;;  %785 = vst [vmem:[#allocation3 + $0x2c] sm:$0xff] (!%p3236_p4), %v784_v9  }
  0x1e   : > { %s4025_s27 = scalar_lea.vmem %s4581_s12, %s3233_s18  ;;  %s4030_s15 = scalar_lea.vmem %s4582_s13, %s3381_s0  ;;  %781 = vst [vmem:[#allocation3 + $0x24] sm:$0xf] (!%p3236_p4), %v780_v7  ;;  %783 = vst [vmem:[#allocation3 + $0x28] sm:$0xf] (!%p3236_p4), %v782_v8  ;;  %v788_v10 = vld [vmem:[%s4586_s17 + $0x38] sm:$0xf] (!%p3236_p4) }
  0x1f   : > { %v790_v11 = vld [vmem:[%s4586_s17 + $0x34] sm:$0xf]  ;;  %789 = vst [vmem:[#allocation3 + $0x34] sm:$0xf] %v788_v10  ;;  %v792_v12 = vld [vmem:[%s4586_s17 + $0x3c] sm:$0xff]   ;;  %v800_v15 = vld [vmem:[%s4586_s17 + $0x4c] sm:$0xff]  }
  0x20   : > { %791 = vst [vmem:[#allocation3 + $0x38] sm:$0xf] %v790_v11  ;;  %v796_v13 = vld [vmem:[%s4586_s17 + $0x48] sm:$0xf]  ;;  %v798_v14 = vld [vmem:[%s4586_s17 + $0x44] sm:$0xf] }
  0x21   : > { %793 = vst [vmem:[#allocation3 + $0x3c] sm:$0xff] %v792_v12   ;;  %797 = vst [vmem:[#allocation3 + $0x44] sm:$0xf] %v796_v13  ;;  %v804_v16 = vld [vmem:[%s4586_s17 + $0x58] sm:$0xf]  ;;  %v808_v18 = vld [vmem:[%s4586_s17 + $0x5c] sm:$0xff]  }
  0x22   : > { %799 = vst [vmem:[#allocation3 + $0x48] sm:$0xf] %v798_v14  ;;  %v806_v17 = vld [vmem:[%s4586_s17 + $0x54] sm:$0xf]  ;;  %801 = vst [vmem:[#allocation3 + $0x4c] sm:$0xff] %v800_v15   ;;  %v816_v21 = vld [vmem:[%s4586_s17 + $0x6c] sm:$0xff]  }
  0x23   : > { %805 = vst [vmem:[#allocation3 + $0x54] sm:$0xf] %v804_v16  ;;  %807 = vst [vmem:[#allocation3 + $0x58] sm:$0xf] %v806_v17  ;;  %v812_v19 = vld [vmem:[%s4586_s17 + $0x68] sm:$0xf] }
  0x24   : > { %v814_v20 = vld [vmem:[%s4586_s17 + $0x64] sm:$0xf]  ;;  %809 = vst [vmem:[#allocation3 + $0x5c] sm:$0xff] %v808_v18   ;;  %813 = vst [vmem:[#allocation3 + $0x64] sm:$0xf] %v812_v19 }
  0x25   : > { %815 = vst [vmem:[#allocation3 + $0x68] sm:$0xf] %v814_v20  ;;  %v820_v22 = vld [vmem:[%s4586_s17 + $0x78] sm:$0xf]  ;;  %v822_v23 = vld [vmem:[%s4586_s17 + $0x74] sm:$0xf] }
  0x26   : > { %817 = vst [vmem:[#allocation3 + $0x6c] sm:$0xff] %v816_v21   ;;  %821 = vst [vmem:[#allocation3 + $0x74] sm:$0xf] %v820_v22  ;;  %v824_v24 = vld [vmem:[%s4586_s17 + $0x7c] sm:$0xf] }
  0x27   : > { %823 = vst [vmem:[#allocation3 + $0x78] sm:$0xf] %v822_v23  ;;  %825 = vst [vmem:[#allocation3 + $0x7c] sm:$0xf] %v824_v24 }
  0x28   : > { %920 = vsyncadd [#allocation4], 2048  ;;  %s4608_s24 = sld [smem:[#allocation9_spill]]  ;;  %v3854_v27 = vmov 0.0   ;;  %vm3855_vm0 = vmmov 0   ;;  %s4609_s3 = sld [smem:[#allocation8_spill]] }
  0x29   : > { %3492 = vmatprep.subr.bf16.mxu1 %v3854_v27  ;;  %3508 = vmatprep.mubr.msk.bf16.mxu1 %vm3855_vm0, %v3854_v27  ;;  %s4610_s1 = sld [smem:[#allocation10_spill]] }
  0x2e   : > { %v3619_v25 = vld [vmem:[%s4608_s24 + $0x40] sm:$0xff]   ;;  %v3622_v29 = vld [vmem:[%s4608_s24 + $0x48] sm:$0xff]   ;;  %v3625_v32 = vld [vmem:[%s4608_s24 + $0x50] sm:$0xff]  }
  0x2f   : > { %v3620_v26 = vld [vmem:[%s4608_s24] sm:$0xff]   ;;  %3383 = vmatprep.subr.bf16.mxu0 %v3619_v25  ;;  %v3623_v30 = vld [vmem:[%s4608_s24 + $0x8] sm:$0xff]   ;;  %v3626_v33 = vld [vmem:[%s4608_s24 + $0x10] sm:$0xff]  }
  0x30   : > { %v3621_v28 = vld [vmem:[%s4608_s24 + $0x80] sm:$0xff]   ;;  %3384 = vmatpush3.bf16.msra.mxu0 %v3620_v26  ;;  %v3624_v31 = vld [vmem:[%s4608_s24 + $0x88] sm:$0xff]   ;;  %v3627_v34 = vld [vmem:[%s4608_s24 + $0x90] sm:$0xff]  }
  0x31   : > { %3493 = vmatpush3.bf16.msra.mxu1 %v3621_v28  ;;  %3385 = vmatprep.subr.bf16.mxu0 %v3622_v29  ;;  %v3628_v35 = vld [vmem:[%s4608_s24 + $0x58] sm:$0xff]   ;;  %v3631_v38 = vld [vmem:[%s4608_s24 + $0x60] sm:$0xff]   ;;  %v3634_v41 = vld [vmem:[%s4608_s24 + $0x68] sm:$0xff]  }
  0x32   : > { %3494 = vmatprep.subr.bf16.mxu1 %v3854_v27  ;;  %v3629_v36 = vld [vmem:[%s4608_s24 + $0x18] sm:$0xff]   ;;  %v3632_v39 = vld [vmem:[%s4608_s24 + $0x20] sm:$0xff]   ;;  %v3635_v42 = vld [vmem:[%s4608_s24 + $0x28] sm:$0xff]  }
  0x33   : > { %v3630_v37 = vld [vmem:[%s4608_s24 + $0x98] sm:$0xff]   ;;  %v3633_v40 = vld [vmem:[%s4608_s24 + $0xa0] sm:$0xff]   ;;  %v3636_v43 = vld [vmem:[%s4608_s24 + $0xa8] sm:$0xff]  }
  0x34   : > { %3386 = vmatpush3.bf16.msra.mxu0 %v3623_v30  ;;  %v3637_v44 = vld [vmem:[%s4608_s24 + $0x70] sm:$0xff]   ;;  %v3640_v48 = vld [vmem:[%s4608_s24 + $0x78] sm:$0xff]   ;;  %v3642_v51 = vld [vmem:[%s4609_s3] ss:$12 sps:$4 sm:$0xff]  }
  0x35   : > { %3495 = vmatpush3.bf16.msra.mxu1 %v3624_v31  ;;  %3387 = vmatprep.subr.bf16.mxu0 %v3625_v32  ;;  %v3638_v45 = vld [vmem:[%s4608_s24 + $0x30] sm:$0xff]   ;;  %v3641_v49 = vld [vmem:[%s4608_s24 + $0x38] sm:$0xff]   ;;  %v973_v55 = vld [vmem:[%s4610_s1] sm:$0xff] }
  0x36   : > { %3496 = vmatprep.subr.bf16.mxu1 %v3854_v27  ;;  %v3639_v46 = vld [vmem:[%s4608_s24 + $0xb0] sm:$0xff]   ;;  %v3645_v50 = vld [vmem:[%s4608_s24 + $0xb8] sm:$0xff]   ;;  %v974_v61 = vld [vmem:[%s4610_s1 + $0x8] sm:$0xff] }
  0x37   : > { %v3644_v47 = vld [vmem:[%s4609_s3 + $0x4] ss:$12 sps:$4 sm:$0xff]   ;;  %v3646_v52 = vld [vmem:[%s4609_s3 + $0x8] ss:$12 sps:$4 sm:$0xff]  }
  0x38   : > { %3388 = vmatpush3.bf16.msra.mxu0 %v3626_v33  ;;  %1167 = vmatprep.mubr.bf16.mxu0 %v3644_v47 }
  0x39   : > { %3497 = vmatpush3.bf16.msra.mxu1 %v3627_v34  ;;  %3389 = vmatprep.subr.bf16.mxu0 %v3628_v35 }
  0x3a   : > { %3498 = vmatprep.subr.bf16.mxu1 %v3854_v27 }
  0x3c   : > { %3390 = vmatpush3.bf16.msra.mxu0 %v3629_v36 }
  0x3d   : > { %3499 = vmatpush3.bf16.msra.mxu1 %v3630_v37  ;;  %3391 = vmatprep.subr.bf16.mxu0 %v3631_v38 }
  0x3e   : > { %3500 = vmatprep.subr.bf16.mxu1 %v3854_v27 }
  0x40   : > { %3392 = vmatpush3.bf16.msra.mxu0 %v3632_v39 }
  0x41   : > { %3501 = vmatpush3.bf16.msra.mxu1 %v3633_v40  ;;  %3393 = vmatprep.subr.bf16.mxu0 %v3634_v41 }
  0x42   : > { %3502 = vmatprep.subr.bf16.mxu1 %v3854_v27 }
  0x44   : > { %3394 = vmatpush3.bf16.msra.mxu0 %v3635_v42 }
  0x45   : > { %3503 = vmatpush3.bf16.msra.mxu1 %v3636_v43  ;;  %3395 = vmatprep.subr.bf16.mxu0 %v3637_v44 }
  0x46   : > { %3504 = vmatprep.subr.bf16.mxu1 %v3854_v27 }
  0x48   : > { %3396 = vmatpush3.bf16.msra.mxu0 %v3638_v45 }
  0x49   : > { %3505 = vmatpush3.bf16.msra.mxu1 %v3639_v46  ;;  %3397 = vmatprep.subr.bf16.mxu0 %v3640_v48 }
  0x4a   : > { %3506 = vmatprep.subr.bf16.mxu1 %v3854_v27 }
  0x4c   : > { %3398 = vmatpush3.bf16.msra.mxu0 %v3641_v49 }
  0x4d   : > { %3507 = vmatpush3.bf16.msra.mxu1 %v3645_v50 }
  0x4f   : > { %1168 = vmatmul.mubr.bf16.vlgmr.msra.gmra.mrb[0].mxu0 %v3642_v51 }
  0x50   : > { %3509 = vmatmul.mubr.bf16.vlgmr.msra.gmra.mrb[0].mxu1 %v3646_v52 }
 0x122   : > { %v3399_v53 = vpop.f32.mrb[0].mxu0 }
 0x123   : > { %v3400_v54 = vpop.f32.mrb[1].mxu0  ;;  %v1210_v56 = vpop.f32.mrb[0].mxu1 }
 0x124   : > { %v3401_v57 = vadd.f32 %v3400_v54, %v3399_v53  ;;  %v3402_v58 = vpop.f32.mrb[2].mxu0  ;;  %v3510_v59 = vpop.f32.mrb[1].mxu1 }
 0x125   : > { %v3403_v60 = vpop.f32.mrb[3].mxu0  ;;  %v1213_v62 = vpop.f32.mrb[2].mxu1 }
 0x126   : > { %v1170_v63 = vadd.f32 %v3401_v57, %v973_v55  ;;  %v3404_v0 = vadd.f32 %v3403_v60, %v3402_v58  ;;  %v3511_v1 = vpop.f32.mrb[3].mxu1 }
 0x128   : > { %v1211_v2 = vadd.f32 %v1210_v56, %v1170_v63  ;;  %v1173_v3 = vadd.f32 %v3404_v0, %v974_v61 }
 0x12a   : > { %1217 = vst [vmem:[#allocation2] sm:$0xff] %v1211_v2  ;;  %v1214_v4 = vadd.f32 %v1213_v62, %v1173_v3 }
 0x12c   : > { %1218 = vst [vmem:[#allocation2 + $0x8] sm:$0xff] %v1214_v4 }
 0x12d PF: > { %v3662_v8 = vld [vmem:[%s3996_s19 + $0x4] ss:$12 sps:$4 sm:$0xff]   ;;  %v3856_v9 = vmov 0.0   ;;  %v3664_v11 = vld [vmem:[%s3996_s19] ss:$12 sps:$4 sm:$0xff]   ;;  %v3857_v31 = vmov 0   ;;  %s4613_s26 = scalar_lea.vmem %s4573_s4, %s3975_s20  ;;  %v1301_v62 = vlaneseq  ;;  %s4615_s29 = scalar_lea.vmem %s4579_s10, %s3975_s20 }
 0x12e   : > { %3512 = vmatprep.subr.bf16.mxu1 %v3856_v9  ;;  %1444 = vmatprep.subr.bf16.mxu0 %v3662_v8  ;;  %v3665_v12 = vld [vmem:[%s3996_s19 + $0x8] ss:$12 sps:$4 sm:$0xff]   ;;  %v3668_v14 = vld [vmem:[%s3996_s19 + $0x18] ss:$12 sps:$4 sm:$0xff]   ;;  %v3669_v15 = vld [vmem:[%s3996_s19 + $0x20] ss:$12 sps:$4 sm:$0xff]  }
 0x12f   : > { %1445 = vmatpush1.bf16.msra.mxu0 %v3664_v11  ;;  %3513 = vmatpush3.bf16.msra.mxu1 %v3665_v12  ;;  %v3666_v13 = vld [vmem:[%s3996_s19 + $0x1c] ss:$12 sps:$4 sm:$0xff]   ;;  %v3670_v16 = vld [vmem:[%s3996_s19 + $0x34] ss:$12 sps:$4 sm:$0xff]   ;;  %v3673_v18 = vld [vmem:[%s3996_s19 + $0x38] ss:$12 sps:$4 sm:$0xff]  }
 0x130   : > { %3514 = vmatprep.subr.bf16.mxu1 %v3856_v9  ;;  %1446 = vmatprep.subr.bf16.mxu0 %v3666_v13  ;;  %v3672_v17 = vld [vmem:[%s3996_s19 + $0x30] ss:$12 sps:$4 sm:$0xff]   ;;  %v3674_v19 = vld [vmem:[%s3996_s19 + $0x4c] ss:$12 sps:$4 sm:$0xff]   ;;  %v3676_v20 = vld [vmem:[%s3996_s19 + $0x48] ss:$12 sps:$4 sm:$0xff]  }
 0x131   : > { %v4199_v5 = vld [vmem:[#allocation2] sm:$0xff]  ;;  %v3677_v21 = vld [vmem:[%s3996_s19 + $0x50] ss:$12 sps:$4 sm:$0xff]   ;;  %v3681_v24 = vld [vmem:[%s3996_s19 + $0x68] ss:$12 sps:$4 sm:$0xff]   ;;  %1476 = vmatprep.mubr.bf16.mxu0 %v3857_v31  ;;  %vm3858_vm1 = vmmov 0  }
 0x132   : > { %1223 = vadd.xlane.f32.xlu0 %v4199_v5  ;;  %v1230_v7 = vmul.f32 %v4199_v5, %v4199_v5  ;;  %v3678_v22 = vld [vmem:[%s3996_s19 + $0x64] ss:$12 sps:$4 sm:$0xff]   ;;  %v3680_v23 = vld [vmem:[%s3996_s19 + $0x60] ss:$12 sps:$4 sm:$0xff]   ;;  %v3682_v25 = vld [vmem:[%s3996_s19 + $0x7c] ss:$12 sps:$4 sm:$0xff]   ;;  %3528 = vmatprep.mubr.msk.bf16.mxu1 %vm3858_vm1, %v3856_v9 }
 0x133   : > { %v4201_v6 = vld [vmem:[#allocation2 + $0x8] sm:$0xff]  ;;  %1447 = vmatpush1.bf16.msra.mxu0 %v3668_v14  ;;  %3515 = vmatpush3.bf16.msra.mxu1 %v3669_v15  ;;  %v3684_v26 = vld [vmem:[%s3996_s19 + $0x78] ss:$12 sps:$4 sm:$0xff]   ;;  %v3686_v28 = vld [vmem:[%s3996_s19 + $0x94] ss:$12 sps:$4 sm:$0xff]   ;;  %s4611_s0 = sld [smem:[#allocation11_spill]] }
 0x134   : > { %1232 = vadd.xlane.f32.xlu1 %v1230_v7  ;;  %v1231_v10 = vmul.f32 %v4201_v6, %v4201_v6  ;;  %3516 = vmatprep.subr.bf16.mxu1 %v3856_v9  ;;  %v3685_v27 = vld [vmem:[%s3996_s19 + $0x80] ss:$12 sps:$4 sm:$0xff]   ;;  %v3688_v29 = vld [vmem:[%s3996_s19 + $0x90] ss:$12 sps:$4 sm:$0xff]   ;;  %v3689_v30 = vld [vmem:[%s3996_s19 + $0x98] ss:$12 sps:$4 sm:$0xff]  }
 0x135   : > { %1448 = vmatprep.subr.bf16.mxu0 %v3670_v16  ;;  %v3690_v32 = vld [vmem:[%s3996_s19 + $0xac] ss:$12 sps:$4 sm:$0xff]   ;;  %v3692_v33 = vld [vmem:[%s3996_s19 + $0xa8] ss:$12 sps:$4 sm:$0xff]   ;;  %v3693_v34 = vld [vmem:[%s3996_s19 + $0xb0] ss:$12 sps:$4 sm:$0xff]   ;;  %s4614_s19 = scalar_lea.vmem %s4577_s8, %s3975_s20 }
 0x136   : > { %1225 = vadd.xlane.f32.xlu0 %v4201_v6  ;;  %v3265_v57 = vld [vmem:[%s4613_s26] ss:$0 sm:$0xff]  ;;  %v4262_v63 = vshrl.u32 %v1301_v62, 7  ;;  %vm1531_vm2 = vcmask 261120   ;;  %vm1579_vm3 = vcmask 130048   ;;  %s3860_s7 = smov 64  }
 0x137   : > { %1449 = vmatpush1.bf16.msra.mxu0 %v3672_v17  ;;  %3517 = vmatpush3.bf16.msra.mxu1 %v3673_v18  ;;  %v1299_v2 = vld [vmem:[%s4005_s25] sm:$0x7]  ;;  %s3859_s25 = smov 96   ;;  %s3861_s2 = smov 32   ;;  %vm2039_vm4 = vcmask 523264   ;;  %vm2042_vm5 = vcmask 785408  }
 0x138   : > { %1234 = vadd.xlane.f32.xlu1 %v1231_v10  ;;  %3518 = vmatprep.subr.bf16.mxu1 %v3856_v9  ;;  %v4265_v0 = vsub.s32 0, %v4262_v63  ;;  %v1311_v1 = vsub.s32 2, %v4262_v63  ;;  %v4270_v3 = vsub.s32 1, %v4262_v63  ;;  %p3374_p5 = scmp.ne.s32.totalorder %s3969_s30, 1 }
 0x139   : > { %1450 = vmatprep.subr.bf16.mxu0 %v3674_v19  ;;  %s4612_s23 = scalar_lea.vmem %s4611_s0, %s3975_s20 }
 0x13a   : > { %v3264_v52 = vld [vmem:[%s4612_s23] ss:$0 sm:$0xff]  ;;  %v1304_v4 = vrot.slane %v1299_v2, %v4265_v0  ;;  %v1308_v8 = vrot.slane %v1299_v2, %v4270_v3 }
 0x13b   : > { %1451 = vmatpush1.bf16.msra.mxu0 %v3676_v20  ;;  %3519 = vmatpush3.bf16.msra.mxu1 %v3677_v21 }
 0x13c   : > { %3520 = vmatprep.subr.bf16.mxu1 %v3856_v9  ;;  %1452 = vmatprep.subr.bf16.mxu0 %v3678_v22 }
 0x13f   : > { %1453 = vmatpush1.bf16.msra.mxu0 %v3680_v23  ;;  %3521 = vmatpush3.bf16.msra.mxu1 %v3681_v24 }
 0x140   : > { %1454 = vmatprep.subr.bf16.mxu0 %v3682_v25  ;;  %3522 = vmatprep.subr.bf16.mxu1 %v3856_v9 }
 0x143   : > { %1455 = vmatpush1.bf16.msra.mxu0 %v3684_v26  ;;  %3523 = vmatpush3.bf16.msra.mxu1 %v3685_v27 }
 0x144   : > { %1456 = vmatprep.subr.bf16.mxu0 %v3686_v28  ;;  %3524 = vmatprep.subr.bf16.mxu1 %v3856_v9 }
 0x147   : > { %1457 = vmatpush1.bf16.msra.mxu0 %v3688_v29  ;;  %3525 = vmatpush3.bf16.msra.mxu1 %v3689_v30 }
 0x148   : > { %1458 = vmatprep.subr.bf16.mxu0 %v3690_v32  ;;  %3526 = vmatprep.subr.bf16.mxu1 %v3856_v9 }
 0x14b   : > { %1459 = vmatpush1.bf16.msra.mxu0 %v3692_v33  ;;  %3527 = vmatpush3.bf16.msra.mxu1 %v3693_v34 }
 0x14c   : > { %3532 = vmatprep.subr.bf16.mxu1 %v3856_v9  ;;  %3556 = vmatprep.subr.bf16.mxu0 %v3856_v9 }
 0x1bf   : > { %v1224_v35 = vpop.xlane.xlu0 %1223 }
 0x1c0   : > { %v1228_v36 = vmul.f32 0.0078125, %v1224_v35 }
 0x1c1   : > { %v1233_v37 = vpop.xlane.xlu1 %1232 }
 0x1c2   : > { %v1238_v38 = vmul.f32 %v1228_v36, %v1228_v36  ;;  %v1236_v39 = vmul.f32 0.0078125, %v1233_v37  ;;  %v1242_v49 = vsub.f32 %v4199_v5, %v1228_v36  ;;  %v1312_v5 = vrot.slane %v1299_v2, %v1311_v1 }
 0x1c3   : > { %v1226_v40 = vpop.xlane.xlu0 %1225 }
 0x1c4   : > { %v1240_v41 = vsub.f32 %v1236_v39, %v1238_v38  ;;  %v1229_v42 = vmul.f32 0.0078125, %v1226_v40 }
 0x1c5   : > { %v1235_v43 = vpop.xlane.xlu1 %1234 }
 0x1c6   : > { %v1244_v44 = vadd.f32 1e-06, %v1240_v41  ;;  %v1239_v45 = vmul.f32 %v1229_v42, %v1229_v42  ;;  %v1237_v46 = vmul.f32 0.0078125, %v1235_v43  ;;  %v1243_v53 = vsub.f32 %v4201_v6, %v1229_v42 }
 0x1c8   : > { %3782 = vrsqrt.f32 %v1244_v44  ;;  %v1241_v47 = vsub.f32 %v1237_v46, %v1239_v45 }
 0x1ca   : > { %v1245_v48 = vadd.f32 1e-06, %v1241_v47 }
 0x1cc   : > { %3784 = vrsqrt.f32 %v1245_v48 }
 0x1d2   : > { %v3783_v50 = vpop.eup %3782 }
 0x1d3   : > { %v1248_v51 = vmul.f32 %v3783_v50, %v1242_v49 }
 0x1d5   : > { %v1256_v56 = vmul.f32 %v3264_v52, %v1248_v51 }
 0x1d6   : > { %v3785_v54 = vpop.eup %3784 }
 0x1d7   : > { %v1249_v55 = vmul.f32 %v3785_v54, %v1243_v53  ;;  %v1264_v59 = vadd.f32 %v3265_v57, %v1256_v56 }
 0x1d9   : > { %v1257_v58 = vmul.f32 %v3264_v52, %v1249_v55 }
 0x1db   : > { %v1265_v60 = vadd.f32 %v3265_v57, %v1257_v58 }
 0x1dd   : > { %v1266_v61 = vpack.c.bf16 %v1265_v60, %v1264_v59 }
 0x1df   : > { %1477 = vmatmul.mubr.bf16.vlgmr.msra.gmra.mrb[0].mxu0 %v1266_v61  ;;  %3529 = vmatmul.mubr.bf16.vlgmr.msra.gmra.mrb[0].mxu1 %v1266_v61 }
 0x1e0   : > { %3534 = vmatprep.mubr.msk.bf16.mxu1 %vm3858_vm1, %v3856_v9  ;;  %3558 = vmatprep.mubr.msk.bf16.mxu0 %vm3858_vm1, %v3856_v9 }
 0x2b2   : > { %v1478_v6 = vpop.f32.mrb[0].mxu0  ;;  %v1521_v7 = vpop.f32.mrb[0].mxu1 }
 0x2b3   : > { %v1480_v10 = vpop.f32.mrb[1].mxu0  ;;  %v3530_v11 = vpop.f32.mrb[1].mxu1  ;;  %v1479_v14 = vadd.f32 %v1478_v6, %v1304_v4  ;;  %v1522_v15 = vadd.f32 %v1521_v7, %v1312_v5 }
 0x2b4   : > { %v1482_v12 = vpop.f32.mrb[2].mxu0  ;;  %v1524_v13 = vpop.f32.mrb[2].mxu1  ;;  %v1481_v20 = vadd.f32 %v1480_v10, %v1308_v8 }
 0x2b5   : > { %v1483_v16 = vadd.f32 %v1482_v12, %v1304_v4  ;;  %v1525_v17 = vadd.f32 %v1524_v13, %v1312_v5  ;;  %v1484_v18 = vpop.f32.mrb[3].mxu0  ;;  %v3531_v19 = vpop.f32.mrb[3].mxu1 }
 0x2b6   : > { %v1485_v21 = vadd.f32 %v1484_v18, %v1308_v8 }
 0x2b7   : > { %v1528_v22 = vpack.c.bf16 %v1483_v16, %v1479_v14  ;;  %v4276_v23 = vpack.c.bf16 %v1525_v17, %v1522_v15 }
 0x2b8   : > { %v1529_v24 = vpack.c.bf16 %v1485_v21, %v1481_v20 }
 0x2ba   : > { %v1536_v25 = vsel %vm1531_vm2, %v1529_v24, 0 }
 0x2bb   : > { %3533 = vmatpush3.bf16.xpose.msra.mxu1 %v1536_v25 }
 0x2bc   : > { %3538 = vmatprep.subr.bf16.mxu1 %v3856_v9 }
 0x2c2   : > { %3535 = vmatmul.mubr.msk.bf16.vlgmr.msra.gmra.mrb[4].mxu1 %vm1531_vm2, %v1528_v22 }
 0x2c3   : > { %3539 = vmatpush3.bf16.msra.mxu1 %v4276_v23  ;;  %3540 = vmatprep.mubr.msk.bf16.mxu1 %vm3858_vm1, %v3856_v9 }
 0x2c4   : > { %3544 = vmatprep.subr.bf16.mxu1 %v3856_v9 }
 0x395   : > { %v1572_v26 = vpop.f32.mrb[4].mxu1 }
 0x396   : > { %v3536_v27 = vpop.f32.mrb[5].mxu1  ;;  %v1580_v28 = vsel %vm1579_vm3, %v1572_v26, -inf }
 0x397   : > { %1581 = vmax.xlane.f32.xlu0 %v1580_v28  ;;  %v1575_v29 = vpop.f32.mrb[6].mxu1 }
 0x398   : > { %v3537_v30 = vpop.f32.mrb[7].mxu1  ;;  %v1583_v32 = vsel %vm1579_vm3, %v1575_v29, -inf }
 0x399   : > { %1584 = vmax.xlane.f32.xlu1 %v1583_v32 }
 0x424   : > { %v1582_v33 = vpop.xlane.xlu0 %1581 }
 0x425   : > { %v1586_v34 = vsub.f32 %v1572_v26, %v1582_v33 }
 0x426   : > { %v1585_v35 = vpop.xlane.xlu1 %1584 }
 0x427   : > { %v1588_v36 = vmul.f32 1.442695, %v1586_v34  ;;  %v1587_v37 = vsub.f32 %v1575_v29, %v1585_v35 }
 0x429   : > { %3786 = vpow2.f32 %v1588_v36  ;;  %v1590_v38 = vmul.f32 1.442695, %v1587_v37 }
 0x42b   : > { %3788 = vpow2.f32 %v1590_v38 }
 0x433   : > { %v3787_v39 = vpop.eup %3786 }
 0x434   : > { %v1592_v40 = vsel %vm1579_vm3, %v3787_v39, 0.0 }
 0x435   : > { %v3789_v41 = vpop.eup %3788  ;;  %1593 = vadd.xlane.f32.xlu0 %v1592_v40 }
 0x436   : > { %v1595_v42 = vsel %vm1579_vm3, %v3789_v41, 0.0 }
 0x437   : > { %1596 = vadd.xlane.f32.xlu1 %v1595_v42 }
 0x448   : > { %1648 = vrot.lane.b32.xlu1 %v1528_v22, %s3859_s25 }
 0x44b   : > { %1651 = vrot.lane.b32.xlu0 %v1529_v24, %s3859_s25 }
 0x44c   : > { %1773 = vrot.lane.b32.xlu1 %v1529_v24, %s3860_s7 }
 0x44f   : > { %1894 = vrot.lane.b32.xlu0 %v1529_v24, %s3861_s2 }
 0x450   : > { %1771 = vrot.lane.b32.xlu1 %v1528_v22, %s3860_s7 }
 0x454   : > { %1892 = vrot.lane.b32.xlu1 %v1528_v22, %s3861_s2 }
 0x4c2   : > { %v1594_v43 = vpop.xlane.xlu0 %1593 }
 0x4c3   : > { %3790 = vrcp.f32 %v1594_v43 }
 0x4c4   : > { %v1597_v44 = vpop.xlane.xlu1 %1596 }
 0x4c5   : > { %3792 = vrcp.f32 %v1597_v44 }
 0x4c6   : > { %v1652_v46 = vpop.permute.xlu0 %1651 }
 0x4c7   : > { %v1657_v55 = vsel %vm1531_vm2, %v1652_v46, 0 }
 0x4c8   : > { %v1649_v45 = vpop.permute.xlu1 %1648 }
 0x4ca   : > { %v1895_v53 = vpop.permute.xlu0 %1894 }
 0x4cb   : > { %v1900_v57 = vsel %vm1531_vm2, %v1895_v53, 0 }
 0x4cc   : > { %v1774_v47 = vpop.permute.xlu1 %1773 }
 0x4cd   : > { %v3791_v48 = vpop.eup %3790  ;;  %v1779_v49 = vsel %vm1531_vm2, %v1774_v47, 0 }
 0x4ce   : > { %3557 = vmatpush3.bf16.xpose.msra.mxu0 %v1779_v49  ;;  %v1600_v51 = vmul.f32 %v3791_v48, %v3787_v39 }
 0x4cf   : > { %v3793_v50 = vpop.eup %3792  ;;  %3568 = vmatprep.subr.bf16.mxu0 %v3856_v9 }
 0x4d0   : > { %v1601_v52 = vmul.f32 %v3793_v50, %v3789_v41  ;;  %v1772_v56 = vpop.permute.xlu1 %1771 }
 0x4d2   : > { %v1602_v54 = vpack.c.bf16 %v1601_v52, %v1600_v51 }
 0x4d4   : > { %3541 = vmatmul.mubr.msk.bf16.vlgmr.msra.gmra.mrb[8].mxu1 %vm1579_vm3, %v1602_v54  ;;  %v1893_v58 = vpop.permute.xlu1 %1892 }
 0x4d5   : > { %3545 = vmatpush3.bf16.xpose.msra.mxu1 %v1657_v55  ;;  %3559 = vmatmul.mubr.msk.bf16.vlgmr.msra.gmra.mrb[4].mxu0 %vm1531_vm2, %v1772_v56 }
 0x4d6   : > { %3569 = vmatpush3.bf16.xpose.msra.mxu0 %v1900_v57  ;;  %3546 = vmatprep.mubr.msk.bf16.mxu1 %vm3858_vm1, %v3856_v9 }
 0x4d7   : > { %3570 = vmatprep.mubr.msk.bf16.mxu0 %vm3858_vm1, %v3856_v9  ;;  %3550 = vmatprep.subr.bf16.mxu1 %v3856_v9 }
 0x4d8   : > { %3580 = vmatprep.subr.bf16.mxu0 %v3856_v9 }
 0x4dc   : > { %3547 = vmatmul.mubr.msk.bf16.vlgmr.msra.gmra.mrb[12].mxu1 %vm1531_vm2, %v1649_v45 }
 0x4dd   : > { %3571 = vmatmul.mubr.msk.bf16.vlgmr.msra.gmra.mrb[8].mxu0 %vm1531_vm2, %v1893_v58  ;;  %3552 = vmatprep.mubr.msk.bf16.mxu1 %vm3858_vm1, %v3856_v9 }
 0x4de   : > { %3596 = vmatprep.mubr.msk.bf16.mxu0 %vm3858_vm1, %v3856_v9 }
 0x5a7   : > { %v4313_v59 = vpop.f32.mrb[8].mxu1 }
 0x5a8   : > { %v3542_v60 = vpop.f32.mrb[9].mxu1  ;;  %v1815_v61 = vpop.f32.mrb[4].mxu0 }
 0x5a9   : > { %v4315_v62 = vpop.f32.mrb[10].mxu1  ;;  %v3560_v2 = vpop.f32.mrb[5].mxu0  ;;  %v1822_v18 = vsel %vm1579_vm3, %v1815_v61, -inf }
 0x5aa   : > { %v3543_v4 = vpop.f32.mrb[11].mxu1  ;;  %v1818_v5 = vpop.f32.mrb[6].mxu0 }
 0x5ab   : > { %v3561_v6 = vpop.f32.mrb[7].mxu0  ;;  %v1825_v20 = vsel %vm1579_vm3, %v1818_v5, -inf }
 0x5af   : > { %v1693_v7 = vpop.f32.mrb[12].mxu1 }
 0x5b0   : > { %v3548_v8 = vpop.f32.mrb[13].mxu1  ;;  %v1936_v10 = vpop.f32.mrb[8].mxu0  ;;  %v1700_v11 = vsel %vm1579_vm3, %v1693_v7, -inf }
 0x5b1   : > { %v3572_v12 = vpop.f32.mrb[9].mxu0  ;;  %1701 = vmax.xlane.f32.xlu0 %v1700_v11  ;;  %v1696_v13 = vpop.f32.mrb[14].mxu1  ;;  %v1943_v21 = vsel %vm1579_vm3, %v1936_v10, -inf }
 0x5b2   : > { %v3549_v14 = vpop.f32.mrb[15].mxu1  ;;  %v1939_v15 = vpop.f32.mrb[10].mxu0  ;;  %v1703_v16 = vsel %vm1579_vm3, %v1696_v13, -inf }
 0x5b3   : > { %v3573_v17 = vpop.f32.mrb[11].mxu0  ;;  %1704 = vmax.xlane.f32.xlu1 %v1703_v16  ;;  %v1946_v19 = vsel %vm1579_vm3, %v1939_v15, -inf }
 0x5b5   : > { %1823 = vmax.xlane.f32.xlu0 %v1822_v18 }
 0x5b7   : > { %1947 = vmax.xlane.f32.xlu1 %v1946_v19 }
 0x5b9   : > { %1826 = vmax.xlane.f32.xlu0 %v1825_v20  ;;  %v3694_v20 = vld [vmem:[%s3991_s21] sm:$0xff]  }
 0x5ba   : > { %3581 = vmatpush3.bf16.msra.mxu0 %v3694_v20  ;;  %v3716_v20 = vld [vmem:[%s4019_s5 + $0x44] ss:$16 sps:$4 sm:$0xff]  }
 0x5bb   : > { %3582 = vmatprep.subr.bf16.mxu0 %v3856_v9 }
 0x5bd   : > { %1944 = vmax.xlane.f32.xlu0 %v1943_v21  ;;  %v3695_v21 = vld [vmem:[%s3991_s21 + $0x8] sm:$0xff]  }
 0x5be   : > { %3583 = vmatpush3.bf16.msra.mxu0 %v3695_v21  ;;  %v3719_v21 = vld [vmem:[%s4019_s5 + $0x4c] ss:$16 sps:$4 sm:$0xff]  }
 0x5bf   : > { %3584 = vmatprep.subr.bf16.mxu0 %v3856_v9 }
 0x63e   : > { %v1702_v22 = vpop.xlane.xlu0 %1701 }
 0x63f   : > { %v1706_v33 = vsub.f32 %v1693_v7, %v1702_v22  ;;  %v3696_v22 = vld [vmem:[%s3991_s21 + $0x10] sm:$0xff]  }
 0x640   : > { %v1705_v24 = vpop.xlane.xlu1 %1704  ;;  %3585 = vmatpush3.bf16.msra.mxu0 %v3696_v22  ;;  %v3714_v22 = vld [vmem:[%s4019_s5 + $0x40] ss:$16 sps:$4 sm:$0xff]  }
 0x641   : > { %v1707_v34 = vsub.f32 %v1696_v13, %v1705_v24  ;;  %v1708_v39 = vmul.f32 1.442695, %v1706_v33  ;;  %3586 = vmatprep.subr.bf16.mxu0 %v3856_v9  ;;  %v3697_v24 = vld [vmem:[%s3991_s21 + $0x18] sm:$0xff]   ;;  %v3700_v33 = vld [vmem:[%s3991_s21 + $0x30] sm:$0xff]  }
 0x642   : > { %v1824_v25 = vpop.xlane.xlu0 %1823 }
 0x643   : > { %v1828_v26 = vsub.f32 %v1815_v61, %v1824_v25  ;;  %v1710_v40 = vmul.f32 1.442695, %v1707_v34  ;;  %v3698_v25 = vld [vmem:[%s3991_s21 + $0x20] sm:$0xff]  }
 0x644   : > { %v1948_v27 = vpop.xlane.xlu1 %1947  ;;  %3587 = vmatpush3.bf16.msra.mxu0 %v3697_v24  ;;  %v3717_v24 = vld [vmem:[%s4019_s5 + $0x48] ss:$16 sps:$4 sm:$0xff]  }
 0x645   : > { %v1830_v28 = vmul.f32 1.442695, %v1828_v26  ;;  %v1950_v29 = vsub.f32 %v1939_v15, %v1948_v27  ;;  %3588 = vmatprep.subr.bf16.mxu0 %v3856_v9 }
 0x646   : > { %v1827_v30 = vpop.xlane.xlu0 %1826 }
 0x647   : > { %3794 = vpow2.f32 %v1830_v28  ;;  %v1829_v32 = vsub.f32 %v1818_v5, %v1827_v30  ;;  %v1953_v35 = vmul.f32 1.442695, %v1950_v29  ;;  %v3699_v28 = vld [vmem:[%s3991_s21 + $0x28] sm:$0xff]  }
 0x648   : > { %3589 = vmatpush3.bf16.msra.mxu0 %v3698_v25  ;;  %v3722_v25 = vld [vmem:[%s4019_s5 + $0x64] ss:$16 sps:$4 sm:$0xff]  }
 0x649   : > { %v1832_v36 = vmul.f32 1.442695, %v1829_v32  ;;  %3590 = vmatprep.subr.bf16.mxu0 %v3856_v9 }
 0x64a   : > { %v1945_v37 = vpop.xlane.xlu0 %1944 }
 0x64b   : > { %3796 = vpow2.f32 %v1832_v36  ;;  %v1949_v38 = vsub.f32 %v1936_v10, %v1945_v37  ;;  %v3701_v36 = vld [vmem:[%s3991_s21 + $0x38] sm:$0xff]  }
 0x64c   : > { %3798 = vpow2.f32 %v1953_v35  ;;  %3591 = vmatpush3.bf16.msra.mxu0 %v3699_v28  ;;  %v3723_v28 = vld [vmem:[%s4019_s5 + $0x68] ss:$16 sps:$4 sm:$0xff]  }
 0x64d   : > { %v1951_v41 = vmul.f32 1.442695, %v1949_v38  ;;  %3592 = vmatprep.subr.bf16.mxu0 %v3856_v9 }
 0x64f   : > { %3800 = vpow2.f32 %v1951_v41 }
 0x650   : > { %3802 = vpow2.f32 %v1708_v39  ;;  %3593 = vmatpush3.bf16.msra.mxu0 %v3700_v33  ;;  %v3731_v33 = vld [vmem:[%s4019_s5 + $0x8c] ss:$16 sps:$4 sm:$0xff]  }
 0x651   : > { %v3795_v42 = vpop.eup %3794  ;;  %3804 = vpow2.f32 %v1710_v40  ;;  %3594 = vmatprep.subr.bf16.mxu0 %v3856_v9 }
 0x652   : > { %v1834_v43 = vsel %vm1579_vm3, %v3795_v42, 0.0 }
 0x653   : > { %1835 = vadd.xlane.f32.xlu0 %v1834_v43 }
 0x654   : > { %3595 = vmatpush3.bf16.msra.mxu0 %v3701_v36  ;;  %v3732_v36 = vld [vmem:[%s4019_s5 + $0xa0] ss:$16 sps:$4 sm:$0xff]  }
 0x655   : > { %v3797_v44 = vpop.eup %3796 }
 0x656   : > { %v1837_v45 = vsel %vm1579_vm3, %v3797_v44, 0.0  ;;  %v3799_v46 = vpop.eup %3798 }
 0x657   : > { %1838 = vadd.xlane.f32.xlu1 %v1837_v45  ;;  %v1958_v50 = vsel %vm1579_vm3, %v3799_v46, 0.0 }
 0x659   : > { %v3801_v47 = vpop.eup %3800 }
 0x65a   : > { %v3803_v48 = vpop.eup %3802  ;;  %v1955_v49 = vsel %vm1579_vm3, %v3801_v47, 0.0 }
 0x65b   : > { %v3805_v51 = vpop.eup %3804  ;;  %1956 = vadd.xlane.f32.xlu0 %v1955_v49  ;;  %1959 = vadd.xlane.f32.xlu1 %v1958_v50  ;;  %v1712_v52 = vsel %vm1579_vm3, %v3803_v48, 0.0 }
 0x65c   : > { %v1715_v53 = vsel %vm1579_vm3, %v3805_v51, 0.0 }
 0x65f   : > { %1713 = vadd.xlane.f32.xlu0 %v1712_v52  ;;  %1716 = vadd.xlane.f32.xlu1 %v1715_v53 }
 0x670   : > { %1845 = vrot.lane.b32.xlu1 %v4276_v23, %s3860_s7 }
 0x674   : > { %1966 = vrot.lane.b32.xlu1 %v4276_v23, %s3861_s2 }
 0x675   : > { %1724 = vrot.lane.b32.xlu0 %v4276_v23, %s3859_s25 }
 0x6e0   : > { %v1836_v54 = vpop.xlane.xlu0 %1835 }
 0x6e4   : > { %v1839_v55 = vpop.xlane.xlu1 %1838 }
 0x6e8   : > { %v1957_v56 = vpop.xlane.xlu0 %1956  ;;  %v1960_v57 = vpop.xlane.xlu1 %1959 }
 0x6ec   : > { %v1714_v58 = vpop.xlane.xlu0 %1713  ;;  %v1717_v60 = vpop.xlane.xlu1 %1716 }
 0x6ed   : > { %3806 = vrcp.f32 %v1714_v58 }
 0x6ee   : > { %3808 = vrcp.f32 %v1717_v60 }
 0x6ef   : > { %3810 = vrcp.f32 %v1839_v55 }
 0x6f0   : > { %v1725_v61 = vpop.permute.xlu0 %1724  ;;  %3812 = vrcp.f32 %v1836_v54  ;;  %v1846_v8 = vpop.permute.xlu1 %1845 }
 0x6f1   : > { %3551 = vmatpush3.bf16.msra.mxu1 %v1725_v61  ;;  %3814 = vrcp.f32 %v1957_v56 }
 0x6f2   : > { %3562 = vmatprep.subr.bf16.mxu1 %v3856_v9  ;;  %3816 = vrcp.f32 %v1960_v57 }
 0x6f4   : > { %v1967_v16 = vpop.permute.xlu1 %1966 }
 0x6f7   : > { %v3807_v2 = vpop.eup %3806 }
 0x6f8   : > { %v3809_v4 = vpop.eup %3808  ;;  %v1720_v5 = vmul.f32 %v3807_v2, %v3803_v48  ;;  %v3306_v2 = vld [vmem:[%s4614_s19] ss:$0 sm:$0xff] }
 0x6f9   : > { %v1721_v6 = vmul.f32 %v3809_v4, %v3805_v51  ;;  %v3811_v7 = vpop.eup %3810 }
 0x6fa   : > { %v3813_v10 = vpop.eup %3812  ;;  %v1843_v11 = vmul.f32 %v3811_v7, %v3797_v44 }
 0x6fb   : > { %v1722_v23 = vpack.c.bf16 %v1721_v6, %v1720_v5  ;;  %v1842_v12 = vmul.f32 %v3813_v10, %v3795_v42  ;;  %v3815_v13 = vpop.eup %3814 }
 0x6fc   : > { %v3817_v15 = vpop.eup %3816  ;;  %v1963_v17 = vmul.f32 %v3815_v13, %v3801_v47  ;;  %v3707_v13 = vld [vmem:[%s4019_s5 + $0xc] ss:$16 sps:$4 sm:$0xff]  }
 0x6fd   : > { %3553 = vmatmul.mubr.msk.bf16.vlgmr.msra.gmra.mrb[16].mxu1 %vm1579_vm3, %v1722_v23  ;;  %v1844_v14 = vpack.c.bf16 %v1843_v11, %v1842_v12  ;;  %v1964_v18 = vmul.f32 %v3817_v15, %v3799_v46  ;;  %v3839_v23 = vld [vmem:[#allocation2 + $0x8] sm:$0xff]  ;;  %v3704_v12 = vld [vmem:[%s4019_s5 + $0x4] ss:$16 sps:$4 sm:$0xff]   ;;  %2464 = vmatprep.subr.bf16.mxu0 %v3707_v13 }
 0x6fe   : > { %3563 = vmatpush3.bf16.msra.mxu1 %v1846_v8  ;;  %3564 = vmatprep.mubr.msk.bf16.mxu1 %vm3858_vm1, %v3856_v9  ;;  %v3705_v15 = vld [vmem:[%s4019_s5 + $0x8] ss:$16 sps:$4 sm:$0xff]   ;;  %v3750_v13 = vld [vmem:[%s4030_s15 + $0x40] sm:$0xff]  }
 0x6ff   : > { %3574 = vmatprep.subr.bf16.mxu1 %v3856_v9  ;;  %v1965_v19 = vpack.c.bf16 %v1964_v18, %v1963_v17  ;;  %v3713_v17 = vld [vmem:[%s4019_s5 + $0x2c] ss:$16 sps:$4 sm:$0xff]   ;;  %v3708_v18 = vld [vmem:[%s4019_s5 + $0x20] ss:$16 sps:$4 sm:$0xff]  }
 0x705   : > { %3565 = vmatmul.mubr.msk.bf16.vlgmr.msra.gmra.mrb[20].mxu1 %vm1579_vm3, %v1844_v14  ;;  %v3702_v14 = vld [vmem:[%s4019_s5] ss:$16 sps:$4 sm:$0xff]  }
 0x706   : > { %3575 = vmatpush3.bf16.msra.mxu1 %v1967_v16  ;;  %3576 = vmatprep.mubr.msk.bf16.mxu1 %vm3858_vm1, %v3856_v9  ;;  %v3710_v16 = vld [vmem:[%s4019_s5 + $0x24] ss:$16 sps:$4 sm:$0xff]  }
 0x707   : > { %2421 = vmatprep.subr.bf16.mxu1 %v3704_v12 }
 0x70d   : > { %3577 = vmatmul.mubr.msk.bf16.vlgmr.msra.gmra.mrb[24].mxu1 %vm1579_vm3, %v1965_v19  ;;  %v3711_v19 = vld [vmem:[%s4019_s5 + $0x28] ss:$16 sps:$4 sm:$0xff]  }
 0x70e   : > { %2453 = vmatprep.mubr.bf16.mxu1 %v3857_v31  ;;  %2422 = vmatpush1.bf16.msra.mxu1 %v3702_v14  ;;  %v3751_v14 = vld [vmem:[%s4030_s15 + $0xc0] sm:$0xff]  }
 0x70f   : > { %2423 = vmatprep.subr.bf16.mxu1 %v3710_v16  ;;  %v3753_v16 = vld [vmem:[%s4030_s15 + $0x80] sm:$0xff]  }
 0x712   : > { %2424 = vmatpush1.bf16.msra.mxu1 %v3708_v18  ;;  %v3755_v18 = vld [vmem:[%s4030_s15 + $0xc8] sm:$0xff]  }
 0x713   : > { %2425 = vmatprep.subr.bf16.mxu1 %v3716_v20  ;;  %v3757_v20 = vld [vmem:[%s4030_s15 + $0x88] sm:$0xff]  }
 0x716   : > { %2426 = vmatpush1.bf16.msra.mxu1 %v3714_v22  ;;  %v3759_v22 = vld [vmem:[%s4030_s15 + $0xd0] sm:$0xff]  }
 0x717   : > { %2427 = vmatprep.subr.bf16.mxu1 %v3722_v25  ;;  %v3761_v25 = vld [vmem:[%s4030_s15 + $0x90] sm:$0xff]  }
 0x7d0   : > { %v1764_v26 = vpop.f32.mrb[16].mxu1 }
 0x7d1   : > { %v3554_v27 = vpop.f32.mrb[17].mxu1 }
 0x7d2   : > { %v1767_v29 = vpop.f32.mrb[18].mxu1  ;;  %v3720_v27 = vld [vmem:[%s4019_s5 + $0x60] ss:$16 sps:$4 sm:$0xff]  }
 0x7d3   : > { %v3647_v30 = vpack.i.bf16 %v1767_v29, %v1764_v26  ;;  %v3555_v32 = vpop.f32.mrb[19].mxu1  ;;  %v3725_v26 = vld [vmem:[%s4019_s5 + $0x6c] ss:$16 sps:$4 sm:$0xff]   ;;  %v3728_v29 = vld [vmem:[%s4019_s5 + $0x84] ss:$16 sps:$4 sm:$0xff]   ;;  %2428 = vmatpush1.bf16.msra.mxu1 %v3720_v27 }
 0x7d4   : > { %v3729_v32 = vld [vmem:[%s4019_s5 + $0x88] ss:$16 sps:$4 sm:$0xff]   ;;  %2429 = vmatprep.subr.bf16.mxu1 %v3728_v29 }
 0x7d5   : > { %3648 = vrot.lane.b32.xlu1 %v3647_v30, %s3861_s2  ;;  %v3726_v30 = vld [vmem:[%s4019_s5 + $0x80] ss:$16 sps:$4 sm:$0xff]   ;;  %v3763_v27 = vld [vmem:[%s4030_s15 + $0xd8] sm:$0xff]  }
 0x7d6   : > { %v3765_v29 = vld [vmem:[%s4030_s15 + $0x98] sm:$0xff]  }
 0x7d7   : > { %2430 = vmatpush1.bf16.msra.mxu1 %v3726_v30  ;;  %v3766_v30 = vld [vmem:[%s4030_s15 + $0x60] sm:$0xff]  }
 0x7d8   : > { %v1885_v34 = vpop.f32.mrb[20].mxu1 }
 0x7d9   : > { %v3566_v35 = vpop.f32.mrb[21].mxu1 }
 0x7da   : > { %v1888_v37 = vpop.f32.mrb[22].mxu1  ;;  %v3737_v35 = vld [vmem:[%s4019_s5 + $0xac] ss:$16 sps:$4 sm:$0xff]  }
 0x7db   : > { %v3652_v38 = vpack.i.bf16 %v1888_v37, %v1885_v34  ;;  %v3567_v39 = vpop.f32.mrb[23].mxu1  ;;  %v3734_v34 = vld [vmem:[%s4019_s5 + $0xa4] ss:$16 sps:$4 sm:$0xff]   ;;  %v3735_v37 = vld [vmem:[%s4019_s5 + $0xa8] ss:$16 sps:$4 sm:$0xff]  }
 0x7dc   : > { %2431 = vmatprep.subr.bf16.mxu1 %v3734_v34  ;;  %v3743_v39 = vld [vmem:[%s4019_s5 + $0xcc] ss:$16 sps:$4 sm:$0xff]   ;;  %v3769_v34 = vld [vmem:[%s4030_s15 + $0xa0] sm:$0xff]  }
 0x7dd   : > { %3653 = vrot.lane.b32.xlu0 %v3652_v38, %s3860_s7  ;;  %v3740_v38 = vld [vmem:[%s4019_s5 + $0xc4] ss:$16 sps:$4 sm:$0xff]   ;;  %2432 = vmatpush1.bf16.msra.mxu1 %v3732_v36  ;;  %v3771_v36 = vld [vmem:[%s4030_s15 + $0xe8] sm:$0xff]  }
 0x7de   : > { %2433 = vmatprep.subr.bf16.mxu1 %v3740_v38  ;;  %v3773_v38 = vld [vmem:[%s4030_s15 + $0xa8] sm:$0xff]  }
 0x7e0   : > { %v2006_v40 = vpop.f32.mrb[24].mxu1 }
 0x7e1   : > { %v3578_v41 = vpop.f32.mrb[25].mxu1 }
 0x7e2   : > { %v2009_v42 = vpop.f32.mrb[26].mxu1  ;;  %v3741_v41 = vld [vmem:[%s4019_s5 + $0xc8] ss:$16 sps:$4 sm:$0xff]  }
 0x7e3   : > { %v3657_v43 = vpack.i.bf16 %v2009_v42, %v2006_v40  ;;  %v3579_v44 = vpop.f32.mrb[27].mxu1  ;;  %v3738_v40 = vld [vmem:[%s4019_s5 + $0xc0] ss:$16 sps:$4 sm:$0xff]   ;;  %v3746_v42 = vld [vmem:[%s4019_s5 + $0xe4] ss:$16 sps:$4 sm:$0xff]  }
 0x7e4   : > { %2434 = vmatpush1.bf16.msra.mxu1 %v3738_v40  ;;  %v3744_v44 = vld [vmem:[%s4019_s5 + $0xe0] ss:$16 sps:$4 sm:$0xff]  }
 0x7e5   : > { %3658 = vrot.lane.b32.xlu1 %v3657_v43, %s3859_s25  ;;  %v3749_v43 = vld [vmem:[%s4019_s5 + $0xec] ss:$16 sps:$4 sm:$0xff]   ;;  %2435 = vmatprep.subr.bf16.mxu1 %v3746_v42  ;;  %v3775_v40 = vld [vmem:[%s4030_s15 + $0xf0] sm:$0xff]  }
 0x7e6   : > { %v3777_v42 = vld [vmem:[%s4030_s15 + $0xb0] sm:$0xff]  }
 0x7e8   : > { %2436 = vmatpush1.bf16.msra.mxu1 %v3744_v44  ;;  %v3779_v44 = vld [vmem:[%s4030_s15 + $0xf8] sm:$0xff]  }
 0x7e9   : > { %3448 = vmatprep.subr.bf16.mxu1 %v3750_v13 }
 0x847   : > { %v3649_v45 = vpop.permute.xlu1 %3648 }
 0x848   : > { %v3651_v47 = vunpack.i.h.bf16 %v3649_v45  ;;  %v3650_v48 = vunpack.i.l.bf16 %v3649_v45  ;;  %v3747_v45 = vld [vmem:[%s4019_s5 + $0xe8] ss:$16 sps:$4 sm:$0xff]  }
 0x84a   : > { %v2038_v51 = vsel %vm1531_vm2, %v4315_v62, %v3651_v47  ;;  %v2037_v52 = vsel %vm1531_vm2, %v4313_v59, %v3650_v48  ;;  %v3838_v62 = vld [vmem:[#allocation2] sm:$0xff] }
 0x84f   : > { %v3654_v46 = vpop.permute.xlu0 %3653 }
 0x850   : > { %v3656_v9 = vunpack.i.h.bf16 %v3654_v46  ;;  %v3655_v49 = vunpack.i.l.bf16 %v3654_v46 }
 0x852   : > { %v2041_v55 = vsel %vm2039_vm4, %v2038_v51, %v3656_v9  ;;  %v2040_v56 = vsel %vm2039_vm4, %v2037_v52, %v3655_v49 }
 0x857   : > { %v3659_v50 = vpop.permute.xlu1 %3658 }
 0x858   : > { %v3661_v53 = vunpack.i.h.bf16 %v3659_v50  ;;  %v3660_v54 = vunpack.i.l.bf16 %v3659_v50 }
 0x85a   : > { %v2044_v57 = vsel %vm2042_vm5, %v2041_v55, %v3661_v53  ;;  %v2043_v58 = vsel %vm2042_vm5, %v2040_v56, %v3660_v54 }
 0x85b   : > { %v2045_v60 = vpack.c.bf16 %v2044_v57, %v2043_v58 }
 0x85d   : > { %3597 = vmatmul.mubr.bf16.vlgmr.msra.gmra.mrb[12].mxu0 %v2045_v60 }
 0x85e   : > { %2496 = vmatprep.mubr.bf16.mxu0 %v3857_v31  ;;  %2465 = vmatpush1.bf16.msra.mxu0 %v3705_v15  ;;  %v3752_v15 = vld [vmem:[%s4030_s15] sm:$0xff]  }
 0x85f   : > { %2466 = vmatprep.subr.bf16.mxu0 %v3713_v17  ;;  %v3754_v17 = vld [vmem:[%s4030_s15 + $0x48] sm:$0xff]  }
 0x862   : > { %2467 = vmatpush1.bf16.msra.mxu0 %v3711_v19  ;;  %v3756_v19 = vld [vmem:[%s4030_s15 + $0x8] sm:$0xff]  }
 0x863   : > { %2468 = vmatprep.subr.bf16.mxu0 %v3719_v21  ;;  %v3758_v21 = vld [vmem:[%s4030_s15 + $0x50] sm:$0xff]  }
 0x866   : > { %2469 = vmatpush1.bf16.msra.mxu0 %v3717_v24  ;;  %v3760_v24 = vld [vmem:[%s4030_s15 + $0x10] sm:$0xff]  }
 0x867   : > { %2470 = vmatprep.subr.bf16.mxu0 %v3725_v26  ;;  %v3762_v26 = vld [vmem:[%s4030_s15 + $0x58] sm:$0xff]  }
 0x86a   : > { %2471 = vmatpush1.bf16.msra.mxu0 %v3723_v28  ;;  %v3764_v28 = vld [vmem:[%s4030_s15 + $0x18] sm:$0xff]  }
 0x86b   : > { %2472 = vmatprep.subr.bf16.mxu0 %v3731_v33  ;;  %v3768_v33 = vld [vmem:[%s4030_s15 + $0x20] sm:$0xff]  }
 0x86e   : > { %2473 = vmatpush1.bf16.msra.mxu0 %v3729_v32  ;;  %v3767_v32 = vld [vmem:[%s4030_s15 + $0xe0] sm:$0xff]  }
 0x86f   : > { %2474 = vmatprep.subr.bf16.mxu0 %v3737_v35  ;;  %v3770_v35 = vld [vmem:[%s4030_s15 + $0x68] sm:$0xff]  }
 0x872   : > { %2475 = vmatpush1.bf16.msra.mxu0 %v3735_v37  ;;  %v3772_v37 = vld [vmem:[%s4030_s15 + $0x28] sm:$0xff]  }
 0x873   : > { %2476 = vmatprep.subr.bf16.mxu0 %v3743_v39  ;;  %v3774_v39 = vld [vmem:[%s4030_s15 + $0x70] sm:$0xff]  }
 0x876   : > { %2477 = vmatpush1.bf16.msra.mxu0 %v3741_v41  ;;  %v3776_v41 = vld [vmem:[%s4030_s15 + $0x30] sm:$0xff]  }
 0x877   : > { %2478 = vmatprep.subr.bf16.mxu0 %v3749_v43  ;;  %v3778_v43 = vld [vmem:[%s4030_s15 + $0x78] sm:$0xff]  }
 0x87a   : > { %2479 = vmatpush1.bf16.msra.mxu0 %v3747_v45  ;;  %v3780_v45 = vld [vmem:[%s4030_s15 + $0x38] sm:$0xff]  }
 0x87b   : > { %3470 = vmatprep.subr.bf16.mxu0 %v3751_v14 }
 0x930   : > { %v2144_v61 = vpop.f32.mrb[12].mxu0 }
 0x931   : > { %v2151_v59 = vadd.f32 %v3838_v62, %v2144_v61  ;;  %v3598_v4 = vpop.f32.mrb[13].mxu0  ;;  %v3307_v62 = vld [vmem:[%s719_s28] ss:$0 sm:$0xff] }
 0x932   : > { %v2147_v5 = vpop.f32.mrb[14].mxu0 }
 0x933   : > { %v4373_v6 = vadd.f32 %v3306_v2, %v2151_v59  ;;  %v2152_v7 = vadd.f32 %v3839_v23, %v2147_v5  ;;  %v3599_v8 = vpop.f32.mrb[15].mxu0 }
 0x935   : > { %v4375_v31 = vadd.f32 %v3306_v2, %v2152_v7  ;;  %2164 = vadd.xlane.f32.xlu0 %v4373_v6  ;;  %v2170_v10 = vmul.f32 %v4373_v6, %v4373_v6  ;;  %v3308_v7 = vld [vmem:[%s4615_s29] ss:$0 sm:$0xff] }
 0x937   : > { %2166 = vadd.xlane.f32.xlu1 %v4375_v31  ;;  %v2171_v11 = vmul.f32 %v4375_v31, %v4375_v31 }
 0x939   : > { %2172 = vadd.xlane.f32.xlu0 %v2170_v10 }
 0x93d   : > { %2174 = vadd.xlane.f32.xlu0 %v2171_v11 }
 0x9c2   : > { %v2165_v46 = vpop.xlane.xlu0 %2164 }
 0x9c3   : > { %v2168_v47 = vmul.f32 0.0078125, %v2165_v46  ;;  %v3781_v46 = vld [vmem:[%s4030_s15 + $0xb8] sm:$0xff]   ;;  %s4616_s15 = scalar_lea.vmem %s4583_s14, %s3975_s20 }
 0x9c4   : > { %v2167_v48 = vpop.xlane.xlu1 %2166 }
 0x9c5   : > { %v2178_v49 = vmul.f32 %v2168_v47, %v2168_v47  ;;  %v2169_v50 = vmul.f32 0.0078125, %v2167_v48  ;;  %v2182_v60 = vsub.f32 %v4373_v6, %v2168_v47  ;;  %v2239_v47 = vld [vmem:[%s4025_s27] sm:$0xf]  ;;  %v2255_v48 = vsub.s32 3, %v4262_v63 }
 0x9c6   : > { %v2173_v9 = vpop.xlane.xlu0 %2172 }
 0x9c7   : > { %v2176_v51 = vmul.f32 0.0078125, %v2173_v9  ;;  %v2179_v54 = vmul.f32 %v2169_v50, %v2169_v50  ;;  %v2183_v59 = vsub.f32 %v4375_v31, %v2169_v50  ;;  %v2244_v9 = vrot.slane %v2239_v47, %v4265_v0 }
 0x9c8   : > { %v2248_v50 = vrot.slane %v2239_v47, %v4270_v3 }
 0x9c9   : > { %v2180_v52 = vsub.f32 %v2176_v51, %v2178_v49  ;;  %v2252_v49 = vrot.slane %v2239_v47, %v1311_v1  ;;  %v2256_v51 = vrot.slane %v2239_v47, %v2255_v48 }
 0x9ca   : > { %v2175_v53 = vpop.xlane.xlu0 %2174 }
 0x9cb   : > { %v2184_v55 = vadd.f32 1e-06, %v2180_v52  ;;  %v2177_v56 = vmul.f32 0.0078125, %v2175_v53 }
 0x9cd   : > { %3818 = vrsqrt.f32 %v2184_v55  ;;  %v2181_v57 = vsub.f32 %v2177_v56, %v2179_v54 }
 0x9cf   : > { %v2185_v58 = vadd.f32 1e-06, %v2181_v57 }
 0x9d1   : > { %3820 = vrsqrt.f32 %v2185_v58 }
 0x9d7   : > { %v3819_v61 = vpop.eup %3818 }
 0x9d8   : > { %v2188_v2 = vmul.f32 %v3819_v61, %v2182_v60 }
 0x9da   : > { %v2196_v23 = vmul.f32 %v3307_v62, %v2188_v2 }
 0x9db   : > { %v3821_v4 = vpop.eup %3820 }
 0x9dc   : > { %v2189_v5 = vmul.f32 %v3821_v4, %v2183_v59  ;;  %v2204_v10 = vadd.f32 %v3308_v7, %v2196_v23 }
 0x9de   : > { %v2197_v8 = vmul.f32 %v3307_v62, %v2189_v5 }
 0x9e0   : > { %v2205_v11 = vadd.f32 %v3308_v7, %v2197_v8 }
 0x9e2   : > { %v2206_v12 = vpack.c.bf16 %v2205_v11, %v2204_v10 }
 0x9e4   : > { %2454 = vmatmul.mubr.bf16.vlgmr.msra.gmra.mrb[28].mxu1 %v2206_v12  ;;  %2497 = vmatmul.mubr.bf16.vlgmr.msra.gmra.mrb[16].mxu0 %v2206_v12 }
 0x9e5   : > { %3449 = vmatpush3.bf16.msra.mxu1 %v3752_v15  ;;  %3471 = vmatpush3.bf16.msra.mxu0 %v3753_v16 }
 0x9e6   : > { %3450 = vmatprep.subr.bf16.mxu1 %v3754_v17  ;;  %3472 = vmatprep.subr.bf16.mxu0 %v3755_v18 }
 0x9e9   : > { %3451 = vmatpush3.bf16.msra.mxu1 %v3756_v19  ;;  %3473 = vmatpush3.bf16.msra.mxu0 %v3757_v20 }
 0x9ea   : > { %3452 = vmatprep.subr.bf16.mxu1 %v3758_v21  ;;  %3474 = vmatprep.subr.bf16.mxu0 %v3759_v22 }
 0x9ed   : > { %3453 = vmatpush3.bf16.msra.mxu1 %v3760_v24  ;;  %3475 = vmatpush3.bf16.msra.mxu0 %v3761_v25 }
 0x9ee   : > { %3454 = vmatprep.subr.bf16.mxu1 %v3762_v26  ;;  %3476 = vmatprep.subr.bf16.mxu0 %v3763_v27 }
 0x9f1   : > { %3455 = vmatpush3.bf16.msra.mxu1 %v3764_v28  ;;  %3477 = vmatpush3.bf16.msra.mxu0 %v3765_v29 }
 0x9f2   : > { %3456 = vmatprep.subr.bf16.mxu1 %v3766_v30  ;;  %3478 = vmatprep.subr.bf16.mxu0 %v3767_v32 }
 0x9f5   : > { %3457 = vmatpush3.bf16.msra.mxu1 %v3768_v33  ;;  %3479 = vmatpush3.bf16.msra.mxu0 %v3769_v34 }
 0x9f6   : > { %3458 = vmatprep.subr.bf16.mxu1 %v3770_v35  ;;  %3480 = vmatprep.subr.bf16.mxu0 %v3771_v36 }
 0x9f9   : > { %3459 = vmatpush3.bf16.msra.mxu1 %v3772_v37  ;;  %3481 = vmatpush3.bf16.msra.mxu0 %v3773_v38 }
 0x9fa   : > { %3460 = vmatprep.subr.bf16.mxu1 %v3774_v39  ;;  %3482 = vmatprep.subr.bf16.mxu0 %v3775_v40 }
 0x9fd   : > { %3461 = vmatpush3.bf16.msra.mxu1 %v3776_v41  ;;  %3483 = vmatpush3.bf16.msra.mxu0 %v3777_v42 }
 0x9fe   : > { %3462 = vmatprep.subr.bf16.mxu1 %v3778_v43  ;;  %3484 = vmatprep.subr.bf16.mxu0 %v3779_v44 }
 0xa01   : > { %3463 = vmatpush3.bf16.msra.mxu1 %v3780_v45  ;;  %3485 = vmatpush3.bf16.msra.mxu0 %v3781_v46 }
 0xab7   : > { %v2455_v52 = vpop.f32.mrb[28].mxu1  ;;  %v2498_v53 = vpop.f32.mrb[16].mxu0 }
 0xab8   : > { %v4465_v54 = vadd.f32 %v2455_v52, %v2244_v9  ;;  %v4467_v55 = vadd.f32 %v2498_v53, %v2252_v49  ;;  %v2457_v56 = vpop.f32.mrb[29].mxu1  ;;  %v2500_v57 = vpop.f32.mrb[17].mxu0 }
 0xab9   : > { %v4469_v58 = vadd.f32 %v2457_v56, %v2248_v50  ;;  %v4471_v60 = vadd.f32 %v2500_v57, %v2256_v51  ;;  %v2459_v61 = vpop.f32.mrb[30].mxu1  ;;  %v2502_v2 = vpop.f32.mrb[18].mxu0 }
 0xaba   : > { %v2507_v63 = vmul.f32 %v4465_v54, %v4465_v54  ;;  %v2509_v1 = vmul.f32 %v4467_v55, %v4467_v55  ;;  %v4477_v62 = vadd.f32 %v2459_v61, %v2244_v9  ;;  %v4479_v59 = vadd.f32 %v2502_v2, %v2252_v49  ;;  %v2461_v4 = vpop.f32.mrb[31].mxu1  ;;  %v2504_v5 = vpop.f32.mrb[19].mxu0 }
 0xabb   : > { %v2508_v23 = vmul.f32 %v4469_v58, %v4469_v58  ;;  %v2510_v7 = vmul.f32 %v4471_v60, %v4471_v60  ;;  %v4485_v8 = vadd.f32 %v2461_v4, %v2248_v50  ;;  %v4487_v10 = vadd.f32 %v2504_v5, %v2256_v51 }
 0xabc   : > { %v2515_v11 = vmul.f32 %v2507_v63, %v4465_v54  ;;  %v2517_v12 = vmul.f32 %v2509_v1, %v4467_v55  ;;  %v2511_v13 = vmul.f32 %v4477_v62, %v4477_v62  ;;  %v2513_v14 = vmul.f32 %v4479_v59, %v4479_v59 }
 0xabd   : > { %v2516_v15 = vmul.f32 %v2508_v23, %v4469_v58  ;;  %v2518_v16 = vmul.f32 %v2510_v7, %v4471_v60  ;;  %v2512_v17 = vmul.f32 %v4485_v8, %v4485_v8  ;;  %v2514_v18 = vmul.f32 %v4487_v10, %v4487_v10 }
 0xabe   : > { %v2523_v19 = vmul.f32 0.044715, %v2515_v11  ;;  %v2525_v20 = vmul.f32 0.044715, %v2517_v12  ;;  %v2519_v21 = vmul.f32 %v2511_v13, %v4477_v62  ;;  %v2521_v22 = vmul.f32 %v2513_v14, %v4479_v59 }
 0xabf   : > { %v2524_v24 = vmul.f32 0.044715, %v2516_v15  ;;  %v2526_v25 = vmul.f32 0.044715, %v2518_v16  ;;  %v2520_v26 = vmul.f32 %v2512_v17, %v4485_v8  ;;  %v2522_v27 = vmul.f32 %v2514_v18, %v4487_v10 }
 0xac0   : > { %v2531_v28 = vadd.f32 %v2523_v19, %v4465_v54  ;;  %v2533_v29 = vadd.f32 %v2525_v20, %v4467_v55  ;;  %v2527_v30 = vmul.f32 0.044715, %v2519_v21  ;;  %v2529_v32 = vmul.f32 0.044715, %v2521_v22 }
 0xac1   : > { %v2532_v33 = vadd.f32 %v2524_v24, %v4469_v58  ;;  %v2534_v34 = vadd.f32 %v2526_v25, %v4471_v60  ;;  %v2528_v35 = vmul.f32 0.044715, %v2520_v26  ;;  %v2530_v36 = vmul.f32 0.044715, %v2522_v27 }
 0xac2   : > { %v2539_v37 = vmul.f32 0.7978846, %v2531_v28  ;;  %v2541_v38 = vmul.f32 0.7978846, %v2533_v29  ;;  %v2535_v39 = vadd.f32 %v2527_v30, %v4477_v62  ;;  %v2537_v40 = vadd.f32 %v2529_v32, %v4479_v59 }
 0xac3   : > { %v2540_v41 = vmul.f32 0.7978846, %v2532_v33  ;;  %v2542_v42 = vmul.f32 0.7978846, %v2534_v34  ;;  %v2536_v43 = vadd.f32 %v2528_v35, %v4485_v8  ;;  %v2538_v44 = vadd.f32 %v2530_v36, %v4487_v10 }
 0xac4   : > { %3822 = vtanh.f32 %v2539_v37  ;;  %v2543_v45 = vmul.f32 0.7978846, %v2535_v39  ;;  %v2545_v46 = vmul.f32 0.7978846, %v2537_v40 }
 0xac5   : > { %3824 = vtanh.f32 %v2541_v38  ;;  %v2544_v47 = vmul.f32 0.7978846, %v2536_v43  ;;  %v2546_v48 = vmul.f32 0.7978846, %v2538_v44  ;;  %v3373_v38 = vld [vmem:[%s4616_s15] ss:$0 sm:$0xff] }
 0xac6   : > { %3826 = vtanh.f32 %v2540_v41 }
 0xac7   : > { %3828 = vtanh.f32 %v2542_v42 }
 0xac8   : > { %3830 = vtanh.f32 %v2543_v45 }
 0xac9   : > { %3832 = vtanh.f32 %v2545_v46 }
 0xaca   : > { %3834 = vtanh.f32 %v2544_v47 }
 0xacb   : > { %3836 = vtanh.f32 %v2546_v48 }
 0xace   : > { %v3823_v9 = vpop.eup %3822 }
 0xacf   : > { %v3825_v49 = vpop.eup %3824  ;;  %v2555_v50 = vadd.f32 1.0, %v3823_v9 }
 0xad0   : > { %v3827_v51 = vpop.eup %3826  ;;  %v2557_v52 = vadd.f32 1.0, %v3825_v49 }
 0xad1   : > { %v3829_v53 = vpop.eup %3828  ;;  %v2556_v56 = vadd.f32 1.0, %v3827_v51  ;;  %v2563_v63 = vmul.f32 0.5, %v2555_v50 }
 0xad2   : > { %v3831_v57 = vpop.eup %3830  ;;  %v2558_v61 = vadd.f32 1.0, %v3829_v53  ;;  %v2565_v5 = vmul.f32 0.5, %v2557_v52 }
 0xad3   : > { %v3833_v2 = vpop.eup %3832  ;;  %v2559_v1 = vadd.f32 1.0, %v3831_v57  ;;  %v2564_v13 = vmul.f32 0.5, %v2556_v56  ;;  %v2571_v17 = vmul.f32 %v2563_v63, %v4465_v54 }
 0xad4   : > { %v3835_v4 = vpop.eup %3834  ;;  %v2561_v23 = vadd.f32 1.0, %v3833_v2  ;;  %v2566_v16 = vmul.f32 0.5, %v2558_v61  ;;  %v2573_v20 = vmul.f32 %v2565_v5, %v4467_v55 }
 0xad5   : > { %v3837_v7 = vpop.eup %3836  ;;  %v2567_v11 = vmul.f32 0.5, %v2559_v1  ;;  %v2560_v12 = vadd.f32 1.0, %v3835_v4  ;;  %v2572_v24 = vmul.f32 %v2564_v13, %v4469_v58 }
 0xad6   : > { %v2569_v14 = vmul.f32 0.5, %v2561_v23  ;;  %v2562_v15 = vadd.f32 1.0, %v3837_v7  ;;  %v2574_v27 = vmul.f32 %v2566_v16, %v4471_v60 }
 0xad7   : > { %v2575_v18 = vmul.f32 %v2567_v11, %v4477_v62  ;;  %v2568_v19 = vmul.f32 0.5, %v2560_v12 }
 0xad8   : > { %v2577_v21 = vmul.f32 %v2569_v14, %v4479_v59  ;;  %v2570_v22 = vmul.f32 0.5, %v2562_v15 }
 0xad9   : > { %v2576_v25 = vmul.f32 %v2568_v19, %v4485_v8  ;;  %v2579_v26 = vpack.c.bf16 %v2575_v18, %v2571_v17 }
 0xada   : > { %v2578_v28 = vmul.f32 %v2570_v22, %v4487_v10  ;;  %v2581_v29 = vpack.c.bf16 %v2577_v21, %v2573_v20 }
 0xadb   : > { %v2580_v30 = vpack.c.bf16 %v2576_v25, %v2572_v24 }
 0xadc   : > { %v2582_v54 = vpack.c.bf16 %v2578_v28, %v2574_v27 }
 0xadd   : > { %2871 = vmatprep.mubr.bf16.mxu1 %v2580_v30 }
 0xade   : > { %2912 = vmatprep.mubr.bf16.mxu0 %v2582_v54  ;;  %2872 = vmatmul.mubr.bf16.vlgmr.msra.gmra.mrb[32].mxu1 %v2579_v26 }
 0xadf   : > { %2913 = vmatmul.mubr.bf16.vlgmr.msra.gmra.mrb[20].mxu0 %v2581_v29 }
 0xbb1   : > { %v3464_v55 = vpop.f32.mrb[32].mxu1 }
 0xbb2   : > { %v3486_v62 = vpop.f32.mrb[20].mxu0  ;;  %v3465_v59 = vpop.f32.mrb[33].mxu1 }
 0xbb3   : > { %v3466_v32 = vadd.f32 %v3465_v59, %v3464_v55  ;;  %v3487_v58 = vpop.f32.mrb[21].mxu0  ;;  %v3467_v33 = vpop.f32.mrb[34].mxu1 }
 0xbb4   : > { %v3488_v8 = vadd.f32 %v3487_v58, %v3486_v62  ;;  %v3489_v34 = vpop.f32.mrb[22].mxu0  ;;  %v3468_v35 = vpop.f32.mrb[35].mxu1 }
 0xbb5   : > { %v3469_v60 = vadd.f32 %v3468_v35, %v3467_v33  ;;  %v3490_v36 = vpop.f32.mrb[23].mxu0 }
 0xbb6   : > { %v2915_v10 = vadd.f32 %v3488_v8, %v3466_v32  ;;  %v3491_v37 = vadd.f32 %v3490_v36, %v3489_v34 }
 0xbb8   : > { %v2921_v39 = vadd.f32 %v2915_v10, %v4373_v6  ;;  %v2918_v40 = vadd.f32 %v3491_v37, %v3469_v60  ;;  %2937 = sbr.rel (%p3374_p5) target bundleno = 3397 (0xd45), region = 137 }
 0xbba   : > { %v4527_v41 = vadd.f32 %v3373_v38, %v2921_v39  ;;  %v2922_v42 = vadd.f32 %v2918_v40, %v4375_v31 }
 0xbbc   : > { %2932 = vst [vmem:[#allocation2] sm:$0xff] %v4527_v41  ;;  %v4531_v43 = vadd.f32 %v3373_v38, %v2922_v42  ;;  %2944 = vadd.xlane.f32.xlu0 (!%p3374_p5), %v4527_v41  ;;  %v2950_v44 = vmul.f32 (!%p3374_p5), %v4527_v41, %v4527_v41 }
 0xbbe   : > { %2933 = vst [vmem:[#allocation2 + $0x8] sm:$0xff] %v4531_v43 }
 0xbbf   : > { %3848 = dma.done.wait [#allocation4], 2048 }
 0xbc0   : > { %3849 = vsyncadd [#allocation4], 4294965248  ;;  %2952 = vadd.xlane.f32.xlu1 %v2950_v44  ;;  %v2951_v6 = vmul.f32 %v4531_v43, %v4531_v43  ;;  %2946 = vadd.xlane.f32.xlu0 %v4531_v43  ;;  %v2988_v31 = vld [vmem:[#allocation3 + $0x8] sm:$0xff]  ;;  %v2987_v45 = vld [vmem:[#allocation3] sm:$0xff]  ;;  %v3862_v53 = vmov 0   ;;  %s4617_s16 = sld [smem:[#allocation14_spill]] }
 0xbc1   : > { %3015 = vmatprep.subr.bf16.mxu0 %v2988_v31  ;;  %v2990_v46 = vld [vmem:[#allocation3 + $0x18] sm:$0xff]  ;;  %v2989_v47 = vld [vmem:[#allocation3 + $0x10] sm:$0xff]  ;;  %v2992_v48 = vld [vmem:[#allocation3 + $0x28] sm:$0xff]  ;;  %3047 = vmatprep.mubr.bf16.mxu0 %v3862_v53  ;;  %s4618_s7 = sld [smem:[#allocation15_spill]]  ;;  %s4619_s18 = sld [smem:[#allocation16_spill]] }
 0xbc2   : > { %3016 = vmatpush1.bf16.msra.mxu0 %v2987_v45  ;;  %v2991_v9 = vld [vmem:[#allocation3 + $0x20] sm:$0xff]  ;;  %v2994_v49 = vld [vmem:[#allocation3 + $0x38] sm:$0xff]  ;;  %v2993_v50 = vld [vmem:[#allocation3 + $0x30] sm:$0xff]  ;;  %s4620_s22 = sld [smem:[#allocation17_spill]] }
 0xbc3   : > { %3017 = vmatprep.subr.bf16.mxu0 %v2990_v46  ;;  %v2996_v51 = vld [vmem:[#allocation3 + $0x48] sm:$0xff]  ;;  %v2995_v52 = vld [vmem:[#allocation3 + $0x40] sm:$0xff]  ;;  %v2998_v56 = vld [vmem:[#allocation3 + $0x58] sm:$0xff] }
 0xbc4   : > { %2954 = vadd.xlane.f32.xlu1 %v2951_v6  ;;  %v2997_v57 = vld [vmem:[#allocation3 + $0x50] sm:$0xff]  ;;  %v3000_v61 = vld [vmem:[#allocation3 + $0x68] sm:$0xff]  ;;  %v2999_v2 = vld [vmem:[#allocation3 + $0x60] sm:$0xff] }
 0xbc5   : > { %v3002_v63 = vld [vmem:[#allocation3 + $0x78] sm:$0xff]  ;;  %v3001_v1 = vld [vmem:[#allocation3 + $0x70] sm:$0xff] }
 0xbc6   : > { %3018 = vmatpush1.bf16.msra.mxu0 %v2989_v47  ;;  %v3375_v25 = vld [vmem:[%s4617_s16] ss:$0 sm:$0xff] }
 0xbc7   : > { %3019 = vmatprep.subr.bf16.mxu0 %v2992_v48  ;;  %v3376_v30 = vld [vmem:[%s4618_s7] ss:$0 sm:$0xff] }
 0xbc8   : > { %v3003_v32 = vld [vmem:[%s4619_s18] sm:$0x3] }
 0xbc9   : > { %v3008_v58 = vrot.slane %v3003_v32, %v4265_v0  ;;  %v3012_v33 = vrot.slane %v3003_v32, %v4270_v3 }
 0xbca   : > { %3020 = vmatpush1.bf16.msra.mxu0 %v2991_v9 }
 0xbcb   : > { %3021 = vmatprep.subr.bf16.mxu0 %v2994_v49 }
 0xbce   : > { %3022 = vmatpush1.bf16.msra.mxu0 %v2993_v50 }
 0xbcf   : > { %3023 = vmatprep.subr.bf16.mxu0 %v2996_v51 }
 0xbd2   : > { %3024 = vmatpush1.bf16.msra.mxu0 %v2995_v52 }
 0xbd3   : > { %3025 = vmatprep.subr.bf16.mxu0 %v2998_v56 }
 0xbd6   : > { %3026 = vmatpush1.bf16.msra.mxu0 %v2997_v57 }
 0xbd7   : > { %3027 = vmatprep.subr.bf16.mxu0 %v3000_v61 }
 0xbda   : > { %3028 = vmatpush1.bf16.msra.mxu0 %v2999_v2 }
 0xbdb   : > { %3029 = vmatprep.subr.bf16.mxu0 %v3002_v63 }
 0xbde   : > { %3030 = vmatpush1.bf16.msra.mxu0 %v3001_v1 }
 0xc49   : > { %v2945_v4 = vpop.xlane.xlu0 %2944 }
 0xc4a   : > { %v2948_v5 = vmul.f32 0.0078125, %v2945_v4 }
 0xc4c   : > { %v2958_v7 = vmul.f32 %v2948_v5, %v2948_v5  ;;  %v2962_v21 = vsub.f32 %v4527_v41, %v2948_v5 }
 0xc4d   : > { %v2953_v23 = vpop.xlane.xlu1 %2952  ;;  %v2947_v12 = vpop.xlane.xlu0 %2946 }
 0xc4e   : > { %v2956_v11 = vmul.f32 0.0078125, %v2953_v23  ;;  %v2949_v14 = vmul.f32 0.0078125, %v2947_v12 }
 0xc50   : > { %v2960_v13 = vsub.f32 %v2956_v11, %v2958_v7  ;;  %v2959_v17 = vmul.f32 %v2949_v14, %v2949_v14  ;;  %v2963_v26 = vsub.f32 %v4531_v43, %v2949_v14 }
 0xc51   : > { %v2955_v15 = vpop.xlane.xlu1 %2954 }
 0xc52   : > { %v2964_v16 = vadd.f32 1e-06, %v2960_v13  ;;  %v2957_v18 = vmul.f32 0.0078125, %v2955_v15 }
 0xc54   : > { %3840 = vrsqrt.f32 %v2964_v16  ;;  %v2961_v19 = vsub.f32 %v2957_v18, %v2959_v17 }
 0xc56   : > { %v2965_v20 = vadd.f32 1e-06, %v2961_v19 }
 0xc58   : > { %3842 = vrsqrt.f32 %v2965_v20 }
 0xc5e   : > { %v3841_v22 = vpop.eup %3840 }
 0xc5f   : > { %v2968_v24 = vmul.f32 %v3841_v22, %v2962_v21 }
 0xc61   : > { %v2976_v29 = vmul.f32 %v3375_v25, %v2968_v24 }
 0xc62   : > { %v3843_v27 = vpop.eup %3842 }
 0xc63   : > { %v2969_v28 = vmul.f32 %v3843_v27, %v2963_v26  ;;  %v2984_v55 = vadd.f32 %v3376_v30, %v2976_v29 }
 0xc65   : > { %v2977_v54 = vmul.f32 %v3375_v25, %v2969_v28 }
 0xc67   : > { %v2985_v62 = vadd.f32 %v3376_v30, %v2977_v54 }
 0xc69   : > { %v2986_v59 = vpack.c.bf16 %v2985_v62, %v2984_v55 }
 0xc6b   : > { %3048 = vmatmul.mubr.bf16.vlgmr.msra.gmra.mrb[0].mxu0 %v2986_v59 }
 0xd3e   : > { %v3049_v8 = vpop.f32.mrb[0].mxu0 }
 0xd3f   : > { %v3050_v34 = vadd.f32 %v3049_v8, %v3008_v58  ;;  %v3051_v35 = vpop.f32.mrb[1].mxu0 }
 0xd40   : > { %v3052_v60 = vadd.f32 %v3051_v35, %v3012_v33  ;;  %v3053_v36 = vpop.f32.mrb[2].mxu0 }
 0xd41   : > { %3058 = vst [vmem:[%s4620_s22] sm:$0xff] %v3050_v34  ;;  %v3054_v10 = vadd.f32 %v3053_v36, %v3008_v58  ;;  %v3055_v37 = vpop.f32.mrb[3].mxu0 }
 0xd42   : > { %3059 = vst [vmem:[%s4620_s22 + $0x8] sm:$0xff] %v3052_v60  ;;  %v3056_v38 = vadd.f32 %v3055_v37, %v3012_v33 }
 0xd43   : > { %3060 = vst [vmem:[%s4620_s22 + $0x10] sm:$0xff] %v3054_v10 }
 0xd44   : > { %3061 = vst [vmem:[%s4620_s22 + $0x18] sm:$0xff] %v3056_v38 }
 0xd45 PF: > { %s4621_s30 = sld [smem:[#allocation7_spill]] }
 0xd4b   : > { %s29_s0 = sadd.s32 1, %s4621_s30  }
 0xd4c   : > { %p26_p6 = scmp.ge.s32.totalorder %s29_s0, 4  }
 0xd4e   :  { %28 = sbr.rel (!%p26_p6) target bundleno = 11 (0xb), region = 210 }
 0xd55   :  { %3073 = vsyncmov [#allocation4] }
 0xd58   :  { %s3074_s20 = vpop.sfrf %3073 }
 0xd59   :  { %p3379_p7 = scmp.ne.s32.totalorder %s3074_s20, 0 }
 0xd5b   :  { %3078 = shalt.err (%p3379_p7)  }

</bundles_post_ra>
